<compile_context>
chip_gen: v7x
topology: tpu7x:2x2x1
jax: 0.10.0
libtpu: 0.0.40
codegen_flags: <defaults>
</compile_context>

<pallas_src>
import functools

import jax
import jax.numpy as jnp
from jax import lax
from jax.experimental import pallas as pl
from jax.experimental.pallas import tpu as pltpu


# ----------------------------------------------------------------------------
# Fused DKM_param.forward kernel: learned-distance -> softmax -> center update,
# iterated to convergence fully on-chip.
# ----------------------------------------------------------------------------
def _dkm_fused_kernel(
    q_ref, x_ref, c0_ref,
    w1x_ref, w1c_ref, w1xc_ref, w1xq_ref, w1cq_ref,
    b1_ref, w2_ref, b2_ref,
    c_out_ref, a_out_ref,
    cnew_scr, diff_scr,
    *, temp, threshold, max_iter, eps,
):
    N, D = x_ref.shape
    K = c0_ref.shape[0]
    inv_temp = 1.0 / temp

    x = x_ref[...]                        # [N, D]
    q = q_ref[...]                        # [1, D]

    # X/q-dependent half of fc1: constant across all DKM iterations -> once.
    xpart = (
        jnp.dot(x, w1x_ref[...], preferred_element_type=jnp.float32)
        + jnp.dot(jnp.abs(x - q), w1xq_ref[...], preferred_element_type=jnp.float32)
    )                                     # [N, L1]

    lane_ids = lax.broadcasted_iota(jnp.int32, (1, K), 1)   # [1, K] = 0..K-1

    def step(c):
        """One DKM iteration with the learned distance MLP."""
        # center-dependent half of fc1 (+ bias)
        cpart = (
            jnp.dot(c, w1c_ref[...], preferred_element_type=jnp.float32)
            + jnp.dot(jnp.abs(c - q), w1cq_ref[...], preferred_element_type=jnp.float32)
            + b1_ref[...]
        )                                 # [K, L1]

        # learned_dist(i,j) = sigmoid(fc2(relu(fc1([x_i, c_j, |x_i-c_j|, |x_i-q|, |c_j-q|]))))
        # K is small & static: unrolled 2-D MXU matmuls, no 3-D tensors.
        pre = jnp.zeros((N, K), jnp.float32)
        for j in range(K):
            c_j = c[j:j + 1, :]                                           # [1, D]
            cross_j = jnp.dot(jnp.abs(x - c_j), w1xc_ref[...],
                              preferred_element_type=jnp.float32)         # [N, L1]
            h_j = jnp.maximum(cross_j + xpart + cpart[j:j + 1, :], 0.0)   # relu(fc1)
            col_j = jnp.dot(h_j, w2_ref[...],
                            preferred_element_type=jnp.float32)           # [N, 1]
            pre = pre + col_j * (lane_ids == j).astype(jnp.float32)       # place col j
        z = pre + b2_ref[...]                                             # [N, K]
        d = -1.0 / (1.0 + jnp.exp(-z))        # -sigmoid(.) = -learned_dist

        # softmax over clusters (dim=1); divide via EUP reciprocal
        logits = d * inv_temp
        m = jnp.max(logits, axis=1, keepdims=True)
        e = jnp.exp(logits - m)
        a = e * pl.reciprocal(jnp.sum(e, axis=1, keepdims=True), approx=True)

        # C_new = (a^T X) / (sum_i a + eps): normalise a's columns first (no
        # [1,K]->[K,1] shuffle), then one dot_general in a^T.X form.
        inv_asum = pl.reciprocal(jnp.sum(a, axis=0, keepdims=True) + eps, approx=True)
        a_norm = a * inv_asum                                             # [N, K]
        c_new = lax.dot_general(a_norm, x, (((0,), (0,)), ((), ())),
                                preferred_element_type=jnp.float32)       # [K, D]
        return a, c_new

    # --- iteration 0: always executed (matches the PyTorch code) ---
    c0 = c0_ref[...]
    a0, cnew0 = step(c0)
    c_out_ref[...] = c0                   # centers used for this `a` (pre-update)
    a_out_ref[...] = a0
    cnew_scr[...] = cnew0
    diff_scr[0] = jnp.sum(jnp.abs(cnew0 - c0))

    # --- convergence loop, fully on-chip: at most max_iter more iterations ---
    def body(_, carry):
        @pl.when(diff_scr[0] > threshold)
        def _():
            c = cnew_scr[...]
            a, c_new = step(c)
            c_out_ref[...] = c
            a_out_ref[...] = a
            cnew_scr[...] = c_new
            diff_scr[0] = jnp.sum(jnp.abs(c_new - c))
        return carry

    lax.fori_loop(0, max_iter, body, 0)


# ----------------------------------------------------------------------------
# DKM_param.forward wrapper: splits/transposes fc1, launches the fused kernel.
# ----------------------------------------------------------------------------
def dkm_param_forward(q, X, C_init, params, *,
                      temp=0.05, threshold=1e-4, max_iter=100, eps=1e-6):
    q = q.astype(jnp.float32)
    X = X.astype(jnp.float32)
    C_init = C_init.astype(jnp.float32)
    N, D = X.shape
    K = C_init.shape[0]

    W1 = params["W1"].astype(jnp.float32)          # [L1, 5D]
    L1 = W1.shape[0]
    # fc1 weight split into its five concatenated-input blocks and pre-transposed
    # to [D, L1] so every in-kernel matmul contracts the hidden dim directly.
    w1x_t, w1c_t, w1xc_t, w1xq_t, w1cq_t = (
        W1[:, i * D:(i + 1) * D].T for i in range(5))
    b1 = params["b1"].astype(jnp.float32).reshape(1, L1)
    w2 = params["W2"].astype(jnp.float32).reshape(L1, 1)   # fc2 weight (transposed)
    b2 = params["b2"].astype(jnp.float32).reshape(1, 1)

    in_arrays = (q, X, C_init, w1x_t, w1c_t, w1xc_t, w1xq_t, w1cq_t, b1, w2, b2)
    full = lambda shape: pl.BlockSpec(shape, lambda: (0, 0))

    C, a = pl.pallas_call(
        functools.partial(_dkm_fused_kernel, temp=temp, threshold=threshold,
                          max_iter=max_iter, eps=eps),
        out_shape=(
            jax.ShapeDtypeStruct((K, D), jnp.float32),
            jax.ShapeDtypeStruct((N, K), jnp.float32),
        ),
        in_specs=[full(arr.shape) for arr in in_arrays],
        out_specs=(full((K, D)), full((N, K))),
        scratch_shapes=[
            pltpu.VMEM((K, D), jnp.float32),   # next centers (loop state, on-chip)
            pltpu.SMEM((1,), jnp.float32),     # L1 diff (convergence gate, on-chip)
        ],
    )(*in_arrays)
    return C, a


# ----------------------------------------------------------------------------
# QuerySpecificDKM.forward
# ----------------------------------------------------------------------------
def query_specific_dkm_forward(query_token_embs, passage_token_embs, k,
                               dkm_params, select_key):
    # sentence embeddings: Transformer -> Pooling (mean). Plain jnp.mean, XLA fuses.
    # TODO(synk): attention mask ignored (all-ones) — real Pooling masks padding.
    query_vec = jnp.mean(query_token_embs.astype(jnp.float32), axis=1)   # [1, D]
    emb_vecs = jnp.mean(passage_token_embs.astype(jnp.float32), axis=1)  # [N, D]

    # init_indices = random.sample(range(n), k)  -> deterministic sample w/o replacement
    idx = jax.random.choice(select_key, emb_vecs.shape[0], shape=(k,), replace=False)
    init_c = emb_vecs[idx]                                               # [k, D]

    C, a = dkm_param_forward(query_vec, emb_vecs, init_c, dkm_params)
    return C, a


def make_dkm_params(key, emb_dim, l1_size):
    """fc1/fc2 parameters of DKM_param (PyTorch nn.Linear default init)."""
    k1, k2, k3, k4 = jax.random.split(key, 4)
    lim1 = 1.0 / (5 * emb_dim) ** 0.5
    lim2 = 1.0 / l1_size ** 0.5
    return {
        "W1": jax.random.uniform(k1, (l1_size, 5 * emb_dim), jnp.float32, -lim1, lim1),
        "b1": jax.random.uniform(k2, (l1_size,), jnp.float32, -lim1, lim1),
        "W2": jax.random.uniform(k3, (1, l1_size), jnp.float32, -lim2, lim2),
        "b2": jax.random.uniform(k4, (1,), jnp.float32, -lim2, lim2),
    }


if __name__ == "__main__":
    key = jax.random.PRNGKey(0)
    k_q, k_p, k_par, k_sel = jax.random.split(key, 4)

    N, L, D = 16, 8, 128     # passages, tokens per passage, hidden dim (lane-dense)
    L1 = 128                 # DKM_param l1_size (kept small & lane-dense for the demo)
    K = 4                    # number of clusters

    # deterministic "encoder outputs" (token embeddings) standing in for the
    # transformer stack
    query_toks = jax.random.normal(k_q, (1, L, D), dtype=jnp.float32)
    passage_toks = jax.random.normal(k_p, (N, L, D), dtype=jnp.float32)
    params = make_dkm_params(k_par, D, L1)

    fwd = jax.jit(query_specific_dkm_forward, static_argnums=(2,))
    C, a = fwd(query_toks, passage_toks, K, params, k_sel)
    jax.block_until_ready((C, a))

    assert C.shape == (K, D)
    assert a.shape == (N, K)
    assert bool(jnp.all(jnp.isfinite(C)))
    assert bool(jnp.all(jnp.isfinite(a)))
    # soft assignments are a softmax over clusters -> rows sum to ~1
    # (loose atol: the softmax denominator uses the EUP approximate reciprocal)
    assert bool(jnp.allclose(jnp.sum(a, axis=1), 1.0, atol=2e-2))

    print("KERNEL_OK")
</pallas_src>

<mosaic_0001>
module attributes {stable_mosaic.version = 11 : i64} {
  func.func @_dkm_fused_kernel(%arg0: memref<1x128xf32, #tpu.memory_space<vmem>>, %arg1: memref<16x128xf32, #tpu.memory_space<vmem>>, %arg2: memref<4x128xf32, #tpu.memory_space<vmem>>, %arg3: memref<128x128xf32, #tpu.memory_space<vmem>>, %arg4: memref<128x128xf32, #tpu.memory_space<vmem>>, %arg5: memref<128x128xf32, #tpu.memory_space<vmem>>, %arg6: memref<128x128xf32, #tpu.memory_space<vmem>>, %arg7: memref<128x128xf32, #tpu.memory_space<vmem>>, %arg8: memref<1x128xf32, #tpu.memory_space<vmem>>, %arg9: memref<128x1xf32, #tpu.memory_space<vmem>>, %arg10: memref<1x1xf32, #tpu.memory_space<vmem>>, %arg11: memref<4x128xf32, #tpu.memory_space<vmem>>, %arg12: memref<16x4xf32, #tpu.memory_space<vmem>>, %arg13: memref<4x128xf32, #tpu.memory_space<vmem>>, %arg14: memref<1xf32, #tpu.memory_space<smem>>) attributes {dimension_semantics = [], scalar_prefetch = 0 : i64, scratch_operands = 2 : i64, tpu.core_type = #tpu.core_type<tc>} {
    %c0 = arith.constant 0 : index
    %c0_0 = arith.constant 0 : index
    %0 = vector.load %arg1[%c0, %c0_0] : memref<16x128xf32, #tpu.memory_space<vmem>>, vector<16x128xf32>
    %c0_1 = arith.constant 0 : index
    %c0_2 = arith.constant 0 : index
    %1 = vector.load %arg0[%c0_1, %c0_2] : memref<1x128xf32, #tpu.memory_space<vmem>>, vector<1x128xf32>
    %c0_3 = arith.constant 0 : index
    %c0_4 = arith.constant 0 : index
    %2 = vector.load %arg3[%c0_3, %c0_4] : memref<128x128xf32, #tpu.memory_space<vmem>>, vector<128x128xf32>
    %cst = arith.constant dense<0.000000e+00> : vector<16x128xf32>
    %3 = tpu.matmul %0, %2, %cst {dimension_numbers = #tpu.dot_dimension_numbers<[1], [0], [0], [1], [0, 0, 1, 1], [], []>} : vector<16x128xf32>, vector<128x128xf32>, vector<16x128xf32> -> vector<16x128xf32>
    %4 = vector.broadcast %1 : vector<1x128xf32> to vector<16x128xf32>
    %5 = arith.subf %0, %4 : vector<16x128xf32>
    %6 = math.absf %5 : vector<16x128xf32>
    %c0_5 = arith.constant 0 : index
    %c0_6 = arith.constant 0 : index
    %7 = vector.load %arg6[%c0_5, %c0_6] : memref<128x128xf32, #tpu.memory_space<vmem>>, vector<128x128xf32>
    %cst_7 = arith.constant dense<0.000000e+00> : vector<16x128xf32>
    %8 = tpu.matmul %6, %7, %cst_7 {dimension_numbers = #tpu.dot_dimension_numbers<[1], [0], [0], [1], [0, 0, 1, 1], [], []>} : vector<16x128xf32>, vector<128x128xf32>, vector<16x128xf32> -> vector<16x128xf32>
    %9 = arith.addf %3, %8 : vector<16x128xf32>
    %10 = tpu.iota {dimensions = array<i32: 1>} : vector<1x4xi32>
    %c0_8 = arith.constant 0 : index
    %c0_9 = arith.constant 0 : index
    %11 = vector.load %arg2[%c0_8, %c0_9] : memref<4x128xf32, #tpu.memory_space<vmem>>, vector<4x128xf32>
    %c0_10 = arith.constant 0 : index
    %c0_11 = arith.constant 0 : index
    %12 = vector.load %arg4[%c0_10, %c0_11] : memref<128x128xf32, #tpu.memory_space<vmem>>, vector<128x128xf32>
    %cst_12 = arith.constant dense<0.000000e+00> : vector<4x128xf32>
    %13 = tpu.matmul %11, %12, %cst_12 {dimension_numbers = #tpu.dot_dimension_numbers<[1], [0], [0], [1], [0, 0, 1, 1], [], []>} : vector<4x128xf32>, vector<128x128xf32>, vector<4x128xf32> -> vector<4x128xf32>
    %14 = vector.broadcast %1 : vector<1x128xf32> to vector<4x128xf32>
    %15 = arith.subf %11, %14 : vector<4x128xf32>
    %16 = math.absf %15 : vector<4x128xf32>
    %c0_13 = arith.constant 0 : index
    %c0_14 = arith.constant 0 : index
    %17 = vector.load %arg7[%c0_13, %c0_14] : memref<128x128xf32, #tpu.memory_space<vmem>>, vector<128x128xf32>
    %cst_15 = arith.constant dense<0.000000e+00> : vector<4x128xf32>
    %18 = tpu.matmul %16, %17, %cst_15 {dimension_numbers = #tpu.dot_dimension_numbers<[1], [0], [0], [1], [0, 0, 1, 1], [], []>} : vector<4x128xf32>, vector<128x128xf32>, vector<4x128xf32> -> vector<4x128xf32>
    %19 = arith.addf %13, %18 : vector<4x128xf32>
    %c0_16 = arith.constant 0 : index
    %c0_17 = arith.constant 0 : index
    %20 = vector.load %arg8[%c0_16, %c0_17] : memref<1x128xf32, #tpu.memory_space<vmem>>, vector<1x128xf32>
    %21 = vector.broadcast %20 : vector<1x128xf32> to vector<4x128xf32>
    %22 = arith.addf %19, %21 : vector<4x128xf32>
    %cst_18 = arith.constant 0.000000e+00 : f32
    %23 = vector.broadcast %cst_18 : f32 to vector<16x4xf32>
    %24 = vector.extract_strided_slice %11 {offsets = [0, 0], sizes = [1, 128], strides = [1, 1]} : vector<4x128xf32> to vector<1x128xf32>
    %25 = vector.broadcast %24 : vector<1x128xf32> to vector<16x128xf32>
    %26 = arith.subf %0, %25 : vector<16x128xf32>
    %27 = math.absf %26 : vector<16x128xf32>
    %c0_19 = arith.constant 0 : index
    %c0_20 = arith.constant 0 : index
    %28 = vector.load %arg5[%c0_19, %c0_20] : memref<128x128xf32, #tpu.memory_space<vmem>>, vector<128x128xf32>
    %cst_21 = arith.constant dense<0.000000e+00> : vector<16x128xf32>
    %29 = tpu.matmul %27, %28, %cst_21 {dimension_numbers = #tpu.dot_dimension_numbers<[1], [0], [0], [1], [0, 0, 1, 1], [], []>} : vector<16x128xf32>, vector<128x128xf32>, vector<16x128xf32> -> vector<16x128xf32>
    %30 = arith.addf %29, %9 : vector<16x128xf32>
    %31 = vector.extract_strided_slice %22 {offsets = [0, 0], sizes = [1, 128], strides = [1, 1]} : vector<4x128xf32> to vector<1x128xf32>
    %32 = vector.broadcast %31 : vector<1x128xf32> to vector<16x128xf32>
    %33 = arith.addf %30, %32 : vector<16x128xf32>
    %cst_22 = arith.constant 0.000000e+00 : f32
    %34 = vector.broadcast %cst_22 : f32 to vector<16x128xf32>
    %35 = arith.maximumf %33, %34 : vector<16x128xf32>
    %c0_23 = arith.constant 0 : index
    %c0_24 = arith.constant 0 : index
    %36 = vector.load %arg9[%c0_23, %c0_24] : memref<128x1xf32, #tpu.memory_space<vmem>>, vector<128x1xf32>
    %cst_25 = arith.constant dense<0.000000e+00> : vector<16x1xf32>
    %37 = tpu.matmul %35, %36, %cst_25 {dimension_numbers = #tpu.dot_dimension_numbers<[1], [0], [0], [1], [0, 0, 1, 1], [], []>} : vector<16x128xf32>, vector<128x1xf32>, vector<16x1xf32> -> vector<16x1xf32>
    %c0_i32 = arith.constant 0 : i32
    %38 = vector.broadcast %c0_i32 : i32 to vector<1x4xi32>
    %39 = arith.cmpi eq, %10, %38 : vector<1x4xi32>
    %40 = arith.extui %39 : vector<1x4xi1> to vector<1x4xi32>
    %41 = arith.sitofp %40 : vector<1x4xi32> to vector<1x4xf32>
    %42 = vector.broadcast %37 : vector<16x1xf32> to vector<16x4xf32>
    %43 = vector.broadcast %41 : vector<1x4xf32> to vector<16x4xf32>
    %44 = arith.mulf %42, %43 : vector<16x4xf32>
    %45 = arith.addf %23, %44 : vector<16x4xf32>
    %46 = vector.extract_strided_slice %11 {offsets = [1, 0], sizes = [1, 128], strides = [1, 1]} : vector<4x128xf32> to vector<1x128xf32>
    %47 = vector.broadcast %46 : vector<1x128xf32> to vector<16x128xf32>
    %48 = arith.subf %0, %47 : vector<16x128xf32>
    %49 = math.absf %48 : vector<16x128xf32>
    %c0_26 = arith.constant 0 : index
    %c0_27 = arith.constant 0 : index
    %50 = vector.load %arg5[%c0_26, %c0_27] : memref<128x128xf32, #tpu.memory_space<vmem>>, vector<128x128xf32>
    %cst_28 = arith.constant dense<0.000000e+00> : vector<16x128xf32>
    %51 = tpu.matmul %49, %50, %cst_28 {dimension_numbers = #tpu.dot_dimension_numbers<[1], [0], [0], [1], [0, 0, 1, 1], [], []>} : vector<16x128xf32>, vector<128x128xf32>, vector<16x128xf32> -> vector<16x128xf32>
    %52 = arith.addf %51, %9 : vector<16x128xf32>
    %53 = vector.extract_strided_slice %22 {offsets = [1, 0], sizes = [1, 128], strides = [1, 1]} : vector<4x128xf32> to vector<1x128xf32>
    %54 = vector.broadcast %53 : vector<1x128xf32> to vector<16x128xf32>
    %55 = arith.addf %52, %54 : vector<16x128xf32>
    %cst_29 = arith.constant 0.000000e+00 : f32
    %56 = vector.broadcast %cst_29 : f32 to vector<16x128xf32>
    %57 = arith.maximumf %55, %56 : vector<16x128xf32>
    %c0_30 = arith.constant 0 : index
    %c0_31 = arith.constant 0 : index
    %58 = vector.load %arg9[%c0_30, %c0_31] : memref<128x1xf32, #tpu.memory_space<vmem>>, vector<128x1xf32>
    %cst_32 = arith.constant dense<0.000000e+00> : vector<16x1xf32>
    %59 = tpu.matmul %57, %58, %cst_32 {dimension_numbers = #tpu.dot_dimension_numbers<[1], [0], [0], [1], [0, 0, 1, 1], [], []>} : vector<16x128xf32>, vector<128x1xf32>, vector<16x1xf32> -> vector<16x1xf32>
    %c1_i32 = arith.constant 1 : i32
    %60 = vector.broadcast %c1_i32 : i32 to vector<1x4xi32>
    %61 = arith.cmpi eq, %10, %60 : vector<1x4xi32>
    %62 = arith.extui %61 : vector<1x4xi1> to vector<1x4xi32>
    %63 = arith.sitofp %62 : vector<1x4xi32> to vector<1x4xf32>
    %64 = vector.broadcast %59 : vector<16x1xf32> to vector<16x4xf32>
    %65 = vector.broadcast %63 : vector<1x4xf32> to vector<16x4xf32>
    %66 = arith.mulf %64, %65 : vector<16x4xf32>
    %67 = arith.addf %45, %66 : vector<16x4xf32>
    %68 = vector.extract_strided_slice %11 {offsets = [2, 0], sizes = [1, 128], strides = [1, 1]} : vector<4x128xf32> to vector<1x128xf32>
    %69 = vector.broadcast %68 : vector<1x128xf32> to vector<16x128xf32>
    %70 = arith.subf %0, %69 : vector<16x128xf32>
    %71 = math.absf %70 : vector<16x128xf32>
    %c0_33 = arith.constant 0 : index
    %c0_34 = arith.constant 0 : index
    %72 = vector.load %arg5[%c0_33, %c0_34] : memref<128x128xf32, #tpu.memory_space<vmem>>, vector<128x128xf32>
    %cst_35 = arith.constant dense<0.000000e+00> : vector<16x128xf32>
    %73 = tpu.matmul %71, %72, %cst_35 {dimension_numbers = #tpu.dot_dimension_numbers<[1], [0], [0], [1], [0, 0, 1, 1], [], []>} : vector<16x128xf32>, vector<128x128xf32>, vector<16x128xf32> -> vector<16x128xf32>
    %74 = arith.addf %73, %9 : vector<16x128xf32>
    %75 = vector.extract_strided_slice %22 {offsets = [2, 0], sizes = [1, 128], strides = [1, 1]} : vector<4x128xf32> to vector<1x128xf32>
    %76 = vector.broadcast %75 : vector<1x128xf32> to vector<16x128xf32>
    %77 = arith.addf %74, %76 : vector<16x128xf32>
    %cst_36 = arith.constant 0.000000e+00 : f32
    %78 = vector.broadcast %cst_36 : f32 to vector<16x128xf32>
    %79 = arith.maximumf %77, %78 : vector<16x128xf32>
    %c0_37 = arith.constant 0 : index
    %c0_38 = arith.constant 0 : index
    %80 = vector.load %arg9[%c0_37, %c0_38] : memref<128x1xf32, #tpu.memory_space<vmem>>, vector<128x1xf32>
    %cst_39 = arith.constant dense<0.000000e+00> : vector<16x1xf32>
    %81 = tpu.matmul %79, %80, %cst_39 {dimension_numbers = #tpu.dot_dimension_numbers<[1], [0], [0], [1], [0, 0, 1, 1], [], []>} : vector<16x128xf32>, vector<128x1xf32>, vector<16x1xf32> -> vector<16x1xf32>
    %c2_i32 = arith.constant 2 : i32
    %82 = vector.broadcast %c2_i32 : i32 to vector<1x4xi32>
    %83 = arith.cmpi eq, %10, %82 : vector<1x4xi32>
    %84 = arith.extui %83 : vector<1x4xi1> to vector<1x4xi32>
    %85 = arith.sitofp %84 : vector<1x4xi32> to vector<1x4xf32>
    %86 = vector.broadcast %81 : vector<16x1xf32> to vector<16x4xf32>
    %87 = vector.broadcast %85 : vector<1x4xf32> to vector<16x4xf32>
    %88 = arith.mulf %86, %87 : vector<16x4xf32>
    %89 = arith.addf %67, %88 : vector<16x4xf32>
    %90 = vector.extract_strided_slice %11 {offsets = [3, 0], sizes = [1, 128], strides = [1, 1]} : vector<4x128xf32> to vector<1x128xf32>
    %91 = vector.broadcast %90 : vector<1x128xf32> to vector<16x128xf32>
    %92 = arith.subf %0, %91 : vector<16x128xf32>
    %93 = math.absf %92 : vector<16x128xf32>
    %c0_40 = arith.constant 0 : index
    %c0_41 = arith.constant 0 : index
    %94 = vector.load %arg5[%c0_40, %c0_41] : memref<128x128xf32, #tpu.memory_space<vmem>>, vector<128x128xf32>
    %cst_42 = arith.constant dense<0.000000e+00> : vector<16x128xf32>
    %95 = tpu.matmul %93, %94, %cst_42 {dimension_numbers = #tpu.dot_dimension_numbers<[1], [0], [0], [1], [0, 0, 1, 1], [], []>} : vector<16x128xf32>, vector<128x128xf32>, vector<16x128xf32> -> vector<16x128xf32>
    %96 = arith.addf %95, %9 : vector<16x128xf32>
    %97 = vector.extract_strided_slice %22 {offsets = [3, 0], sizes = [1, 128], strides = [1, 1]} : vector<4x128xf32> to vector<1x128xf32>
    %98 = vector.broadcast %97 : vector<1x128xf32> to vector<16x128xf32>
    %99 = arith.addf %96, %98 : vector<16x128xf32>
    %cst_43 = arith.constant 0.000000e+00 : f32
    %100 = vector.broadcast %cst_43 : f32 to vector<16x128xf32>
    %101 = arith.maximumf %99, %100 : vector<16x128xf32>
    %c0_44 = arith.constant 0 : index
    %c0_45 = arith.constant 0 : index
    %102 = vector.load %arg9[%c0_44, %c0_45] : memref<128x1xf32, #tpu.memory_space<vmem>>, vector<128x1xf32>
    %cst_46 = arith.constant dense<0.000000e+00> : vector<16x1xf32>
    %103 = tpu.matmul %101, %102, %cst_46 {dimension_numbers = #tpu.dot_dimension_numbers<[1], [0], [0], [1], [0, 0, 1, 1], [], []>} : vector<16x128xf32>, vector<128x1xf32>, vector<16x1xf32> -> vector<16x1xf32>
    %c3_i32 = arith.constant 3 : i32
    %104 = vector.broadcast %c3_i32 : i32 to vector<1x4xi32>
    %105 = arith.cmpi eq, %10, %104 : vector<1x4xi32>
    %106 = arith.extui %105 : vector<1x4xi1> to vector<1x4xi32>
    %107 = arith.sitofp %106 : vector<1x4xi32> to vector<1x4xf32>
    %108 = vector.broadcast %103 : vector<16x1xf32> to vector<16x4xf32>
    %109 = vector.broadcast %107 : vector<1x4xf32> to vector<16x4xf32>
    %110 = arith.mulf %108, %109 : vector<16x4xf32>
    %111 = arith.addf %89, %110 : vector<16x4xf32>
    %c0_47 = arith.constant 0 : index
    %c0_48 = arith.constant 0 : index
    %112 = vector.load %arg10[%c0_47, %c0_48] : memref<1x1xf32, #tpu.memory_space<vmem>>, vector<1x1xf32>
    %113 = vector.broadcast %112 : vector<1x1xf32> to vector<16x4xf32>
    %114 = arith.addf %111, %113 : vector<16x4xf32>
    %cst_49 = arith.constant 0.000000e+00 : f32
    %115 = vector.broadcast %cst_49 : f32 to vector<16x4xf32>
    %116 = arith.subf %115, %114 : vector<16x4xf32>
    %117 = math.exp %116 : vector<16x4xf32>
    %cst_50 = arith.constant 1.000000e+00 : f32
    %118 = vector.broadcast %cst_50 : f32 to vector<16x4xf32>
    %119 = arith.addf %118, %117 : vector<16x4xf32>
    %cst_51 = arith.constant -1.000000e+00 : f32
    %120 = vector.broadcast %cst_51 : f32 to vector<16x4xf32>
    %121 = arith.divf %120, %119 : vector<16x4xf32>
    %cst_52 = arith.constant 2.000000e+01 : f32
    %122 = vector.broadcast %cst_52 : f32 to vector<16x4xf32>
    %123 = arith.mulf %121, %122 : vector<16x4xf32>
    %cst_53 = arith.constant dense<0xFF800000> : vector<16xf32>
    %124 = vector.multi_reduction <maximumf>, %123, %cst_53 [1] : vector<16x4xf32> to vector<16xf32>
    %125 = vector.shape_cast %124 : vector<16xf32> to vector<16x1xf32>
    %126 = vector.broadcast %125 : vector<16x1xf32> to vector<16x4xf32>
    %127 = arith.subf %123, %126 : vector<16x4xf32>
    %128 = math.exp %127 : vector<16x4xf32>
    %cst_54 = arith.constant dense<0.000000e+00> : vector<16xf32>
    %129 = vector.multi_reduction <add>, %128, %cst_54 [1] : vector<16x4xf32> to vector<16xf32>
    %130 = vector.shape_cast %129 : vector<16xf32> to vector<16x1xf32>
    %131 = tpu.reciprocal %130 {approx = true} : vector<16x1xf32> -> vector<16x1xf32>
    %132 = vector.broadcast %131 : vector<16x1xf32> to vector<16x4xf32>
    %133 = arith.mulf %128, %132 : vector<16x4xf32>
    %cst_55 = arith.constant dense<0.000000e+00> : vector<4xf32>
    %134 = vector.multi_reduction <add>, %133, %cst_55 [0] : vector<16x4xf32> to vector<4xf32>
    %135 = vector.shape_cast %134 : vector<4xf32> to vector<1x4xf32>
    %cst_56 = arith.constant 9.99999997E-7 : f32
    %136 = vector.broadcast %cst_56 : f32 to vector<1x4xf32>
    %137 = arith.addf %135, %136 : vector<1x4xf32>
    %138 = tpu.reciprocal %137 {approx = true} : vector<1x4xf32> -> vector<1x4xf32>
    %139 = vector.broadcast %138 : vector<1x4xf32> to vector<16x4xf32>
    %140 = arith.mulf %133, %139 : vector<16x4xf32>
    %cst_57 = arith.constant dense<0.000000e+00> : vector<4x128xf32>
    %141 = tpu.matmul %140, %0, %cst_57 {dimension_numbers = #tpu.dot_dimension_numbers<[0], [0], [1], [1], [0, 1, 1, 1], [], []>} : vector<16x4xf32>, vector<16x128xf32>, vector<4x128xf32> -> vector<4x128xf32>
    %c0_58 = arith.constant 0 : index
    %c0_59 = arith.constant 0 : index
    %142 = vector.load %arg11[%c0_58, %c0_59] : memref<4x128xf32, #tpu.memory_space<vmem>>, vector<4x128xf32>
    tpu.vector_store %arg11[%c0_58, %c0_59], %11 {strides = array<i32>} : memref<4x128xf32, #tpu.memory_space<vmem>>, vector<4x128xf32>,
    %c0_60 = arith.constant 0 : index
    %c0_61 = arith.constant 0 : index
    %143 = vector.load %arg12[%c0_60, %c0_61] : memref<16x4xf32, #tpu.memory_space<vmem>>, vector<16x4xf32>
    tpu.vector_store %arg12[%c0_60, %c0_61], %133 {strides = array<i32>} : memref<16x4xf32, #tpu.memory_space<vmem>>, vector<16x4xf32>,
    %c0_62 = arith.constant 0 : index
    %c0_63 = arith.constant 0 : index
    %144 = vector.load %arg13[%c0_62, %c0_63] : memref<4x128xf32, #tpu.memory_space<vmem>>, vector<4x128xf32>
    tpu.vector_store %arg13[%c0_62, %c0_63], %141 {strides = array<i32>} : memref<4x128xf32, #tpu.memory_space<vmem>>, vector<4x128xf32>,
    %145 = arith.subf %141, %11 : vector<4x128xf32>
    %146 = math.absf %145 : vector<4x128xf32>
    %147 = vector.shape_cast %146 : vector<4x128xf32> to vector<1x4x128xf32>
    %cst_64 = arith.constant dense<0.000000e+00> : vector<1xf32>
    %148 = vector.multi_reduction <add>, %147, %cst_64 [1, 2] : vector<1x4x128xf32> to vector<1xf32>
    %149 = vector.shape_cast %148 : vector<1xf32> to vector<1x1x1xf32>
    %150 = vector.extract %149[0, 0, 0] : f32 from vector<1x1x1xf32>
    %c0_65 = arith.constant 0 : index
    %151 = memref.load %arg14[%c0_65] : memref<1xf32, #tpu.memory_space<smem>>
    memref.store %150, %arg14[%c0_65] : memref<1xf32, #tpu.memory_space<smem>>
    %c0_i32_66 = arith.constant 0 : i32
    %c100_i32 = arith.constant 100 : i32
    %152 = arith.addi %c0_i32_66, %c100_i32 : i32
    %c1_i32_67 = arith.constant 1 : i32
    scf.for %arg15 = %c0_i32_66 to %152 step %c1_i32_67  : i32 {
      %c0_68 = arith.constant 0 : index
      %153 = memref.load %arg14[%c0_68] : memref<1xf32, #tpu.memory_space<smem>>
      %cst_69 = arith.constant 9.99999974E-5 : f32
      %154 = arith.cmpf ogt, %153, %cst_69 : f32
      %155 = arith.extui %154 : i1 to i32
      %c0_i32_70 = arith.constant 0 : i32
      %156 = arith.cmpi ne, %155, %c0_i32_70 : i32
      scf.if %156 {
        %c0_71 = arith.constant 0 : index
        %c0_72 = arith.constant 0 : index
        %157 = vector.load %arg13[%c0_71, %c0_72] : memref<4x128xf32, #tpu.memory_space<vmem>>, vector<4x128xf32>
        %c0_73 = arith.constant 0 : index
        %c0_74 = arith.constant 0 : index
        %158 = vector.load %arg4[%c0_73, %c0_74] : memref<128x128xf32, #tpu.memory_space<vmem>>, vector<128x128xf32>
        %cst_75 = arith.constant dense<0.000000e+00> : vector<4x128xf32>
        %159 = tpu.matmul %157, %158, %cst_75 {dimension_numbers = #tpu.dot_dimension_numbers<[1], [0], [0], [1], [0, 0, 1, 1], [], []>} : vector<4x128xf32>, vector<128x128xf32>, vector<4x128xf32> -> vector<4x128xf32>
        %160 = vector.broadcast %1 : vector<1x128xf32> to vector<4x128xf32>
        %161 = arith.subf %157, %160 : vector<4x128xf32>
        %162 = math.absf %161 : vector<4x128xf32>
        %c0_76 = arith.constant 0 : index
        %c0_77 = arith.constant 0 : index
        %163 = vector.load %arg7[%c0_76, %c0_77] : memref<128x128xf32, #tpu.memory_space<vmem>>, vector<128x128xf32>
        %cst_78 = arith.constant dense<0.000000e+00> : vector<4x128xf32>
        %164 = tpu.matmul %162, %163, %cst_78 {dimension_numbers = #tpu.dot_dimension_numbers<[1], [0], [0], [1], [0, 0, 1, 1], [], []>} : vector<4x128xf32>, vector<128x128xf32>, vector<4x128xf32> -> vector<4x128xf32>
        %165 = arith.addf %159, %164 : vector<4x128xf32>
        %c0_79 = arith.constant 0 : index
        %c0_80 = arith.constant 0 : index
        %166 = vector.load %arg8[%c0_79, %c0_80] : memref<1x128xf32, #tpu.memory_space<vmem>>, vector<1x128xf32>
        %167 = vector.broadcast %166 : vector<1x128xf32> to vector<4x128xf32>
        %168 = arith.addf %165, %167 : vector<4x128xf32>
        %cst_81 = arith.constant 0.000000e+00 : f32
        %169 = vector.broadcast %cst_81 : f32 to vector<16x4xf32>
        %170 = vector.extract_strided_slice %157 {offsets = [0, 0], sizes = [1, 128], strides = [1, 1]} : vector<4x128xf32> to vector<1x128xf32>
        %171 = vector.broadcast %170 : vector<1x128xf32> to vector<16x128xf32>
        %172 = arith.subf %0, %171 : vector<16x128xf32>
        %173 = math.absf %172 : vector<16x128xf32>
        %c0_82 = arith.constant 0 : index
        %c0_83 = arith.constant 0 : index
        %174 = vector.load %arg5[%c0_82, %c0_83] : memref<128x128xf32, #tpu.memory_space<vmem>>, vector<128x128xf32>
        %cst_84 = arith.constant dense<0.000000e+00> : vector<16x128xf32>
        %175 = tpu.matmul %173, %174, %cst_84 {dimension_numbers = #tpu.dot_dimension_numbers<[1], [0], [0], [1], [0, 0, 1, 1], [], []>} : vector<16x128xf32>, vector<128x128xf32>, vector<16x128xf32> -> vector<16x128xf32>
        %176 = arith.addf %175, %9 : vector<16x128xf32>
        %177 = vector.extract_strided_slice %168 {offsets = [0, 0], sizes = [1, 128], strides = [1, 1]} : vector<4x128xf32> to vector<1x128xf32>
        %178 = vector.broadcast %177 : vector<1x128xf32> to vector<16x128xf32>
        %179 = arith.addf %176, %178 : vector<16x128xf32>
        %cst_85 = arith.constant 0.000000e+00 : f32
        %180 = vector.broadcast %cst_85 : f32 to vector<16x128xf32>
        %181 = arith.maximumf %179, %180 : vector<16x128xf32>
        %c0_86 = arith.constant 0 : index
        %c0_87 = arith.constant 0 : index
        %182 = vector.load %arg9[%c0_86, %c0_87] : memref<128x1xf32, #tpu.memory_space<vmem>>, vector<128x1xf32>
        %cst_88 = arith.constant dense<0.000000e+00> : vector<16x1xf32>
        %183 = tpu.matmul %181, %182, %cst_88 {dimension_numbers = #tpu.dot_dimension_numbers<[1], [0], [0], [1], [0, 0, 1, 1], [], []>} : vector<16x128xf32>, vector<128x1xf32>, vector<16x1xf32> -> vector<16x1xf32>
        %c0_i32_89 = arith.constant 0 : i32
        %184 = vector.broadcast %c0_i32_89 : i32 to vector<1x4xi32>
        %185 = arith.cmpi eq, %10, %184 : vector<1x4xi32>
        %186 = arith.extui %185 : vector<1x4xi1> to vector<1x4xi32>
        %187 = arith.sitofp %186 : vector<1x4xi32> to vector<1x4xf32>
        %188 = vector.broadcast %183 : vector<16x1xf32> to vector<16x4xf32>
        %189 = vector.broadcast %187 : vector<1x4xf32> to vector<16x4xf32>
        %190 = arith.mulf %188, %189 : vector<16x4xf32>
        %191 = arith.addf %169, %190 : vector<16x4xf32>
        %192 = vector.extract_strided_slice %157 {offsets = [1, 0], sizes = [1, 128], strides = [1, 1]} : vector<4x128xf32> to vector<1x128xf32>
        %193 = vector.broadcast %192 : vector<1x128xf32> to vector<16x128xf32>
        %194 = arith.subf %0, %193 : vector<16x128xf32>
        %195 = math.absf %194 : vector<16x128xf32>
        %c0_90 = arith.constant 0 : index
        %c0_91 = arith.constant 0 : index
        %196 = vector.load %arg5[%c0_90, %c0_91] : memref<128x128xf32, #tpu.memory_space<vmem>>, vector<128x128xf32>
        %cst_92 = arith.constant dense<0.000000e+00> : vector<16x128xf32>
        %197 = tpu.matmul %195, %196, %cst_92 {dimension_numbers = #tpu.dot_dimension_numbers<[1], [0], [0], [1], [0, 0, 1, 1], [], []>} : vector<16x128xf32>, vector<128x128xf32>, vector<16x128xf32> -> vector<16x128xf32>
        %198 = arith.addf %197, %9 : vector<16x128xf32>
        %199 = vector.extract_strided_slice %168 {offsets = [1, 0], sizes = [1, 128], strides = [1, 1]} : vector<4x128xf32> to vector<1x128xf32>
        %200 = vector.broadcast %199 : vector<1x128xf32> to vector<16x128xf32>
        %201 = arith.addf %198, %200 : vector<16x128xf32>
        %cst_93 = arith.constant 0.000000e+00 : f32
        %202 = vector.broadcast %cst_93 : f32 to vector<16x128xf32>
        %203 = arith.maximumf %201, %202 : vector<16x128xf32>
        %c0_94 = arith.constant 0 : index
        %c0_95 = arith.constant 0 : index
        %204 = vector.load %arg9[%c0_94, %c0_95] : memref<128x1xf32, #tpu.memory_space<vmem>>, vector<128x1xf32>
        %cst_96 = arith.constant dense<0.000000e+00> : vector<16x1xf32>
        %205 = tpu.matmul %203, %204, %cst_96 {dimension_numbers = #tpu.dot_dimension_numbers<[1], [0], [0], [1], [0, 0, 1, 1], [], []>} : vector<16x128xf32>, vector<128x1xf32>, vector<16x1xf32> -> vector<16x1xf32>
        %c1_i32_97 = arith.constant 1 : i32
        %206 = vector.broadcast %c1_i32_97 : i32 to vector<1x4xi32>
        %207 = arith.cmpi eq, %10, %206 : vector<1x4xi32>
        %208 = arith.extui %207 : vector<1x4xi1> to vector<1x4xi32>
        %209 = arith.sitofp %208 : vector<1x4xi32> to vector<1x4xf32>
        %210 = vector.broadcast %205 : vector<16x1xf32> to vector<16x4xf32>
        %211 = vector.broadcast %209 : vector<1x4xf32> to vector<16x4xf32>
        %212 = arith.mulf %210, %211 : vector<16x4xf32>
        %213 = arith.addf %191, %212 : vector<16x4xf32>
        %214 = vector.extract_strided_slice %157 {offsets = [2, 0], sizes = [1, 128], strides = [1, 1]} : vector<4x128xf32> to vector<1x128xf32>
        %215 = vector.broadcast %214 : vector<1x128xf32> to vector<16x128xf32>
        %216 = arith.subf %0, %215 : vector<16x128xf32>
        %217 = math.absf %216 : vector<16x128xf32>
        %c0_98 = arith.constant 0 : index
        %c0_99 = arith.constant 0 : index
        %218 = vector.load %arg5[%c0_98, %c0_99] : memref<128x128xf32, #tpu.memory_space<vmem>>, vector<128x128xf32>
        %cst_100 = arith.constant dense<0.000000e+00> : vector<16x128xf32>
        %219 = tpu.matmul %217, %218, %cst_100 {dimension_numbers = #tpu.dot_dimension_numbers<[1], [0], [0], [1], [0, 0, 1, 1], [], []>} : vector<16x128xf32>, vector<128x128xf32>, vector<16x128xf32> -> vector<16x128xf32>
        %220 = arith.addf %219, %9 : vector<16x128xf32>
        %221 = vector.extract_strided_slice %168 {offsets = [2, 0], sizes = [1, 128], strides = [1, 1]} : vector<4x128xf32> to vector<1x128xf32>
        %222 = vector.broadcast %221 : vector<1x128xf32> to vector<16x128xf32>
        %223 = arith.addf %220, %222 : vector<16x128xf32>
        %cst_101 = arith.constant 0.000000e+00 : f32
        %224 = vector.broadcast %cst_101 : f32 to vector<16x128xf32>
        %225 = arith.maximumf %223, %224 : vector<16x128xf32>
        %c0_102 = arith.constant 0 : index
        %c0_103 = arith.constant 0 : index
        %226 = vector.load %arg9[%c0_102, %c0_103] : memref<128x1xf32, #tpu.memory_space<vmem>>, vector<128x1xf32>
        %cst_104 = arith.constant dense<0.000000e+00> : vector<16x1xf32>
        %227 = tpu.matmul %225, %226, %cst_104 {dimension_numbers = #tpu.dot_dimension_numbers<[1], [0], [0], [1], [0, 0, 1, 1], [], []>} : vector<16x128xf32>, vector<128x1xf32>, vector<16x1xf32> -> vector<16x1xf32>
        %c2_i32_105 = arith.constant 2 : i32
        %228 = vector.broadcast %c2_i32_105 : i32 to vector<1x4xi32>
        %229 = arith.cmpi eq, %10, %228 : vector<1x4xi32>
        %230 = arith.extui %229 : vector<1x4xi1> to vector<1x4xi32>
        %231 = arith.sitofp %230 : vector<1x4xi32> to vector<1x4xf32>
        %232 = vector.broadcast %227 : vector<16x1xf32> to vector<16x4xf32>
        %233 = vector.broadcast %231 : vector<1x4xf32> to vector<16x4xf32>
        %234 = arith.mulf %232, %233 : vector<16x4xf32>
        %235 = arith.addf %213, %234 : vector<16x4xf32>
        %236 = vector.extract_strided_slice %157 {offsets = [3, 0], sizes = [1, 128], strides = [1, 1]} : vector<4x128xf32> to vector<1x128xf32>
        %237 = vector.broadcast %236 : vector<1x128xf32> to vector<16x128xf32>
        %238 = arith.subf %0, %237 : vector<16x128xf32>
        %239 = math.absf %238 : vector<16x128xf32>
        %c0_106 = arith.constant 0 : index
        %c0_107 = arith.constant 0 : index
        %240 = vector.load %arg5[%c0_106, %c0_107] : memref<128x128xf32, #tpu.memory_space<vmem>>, vector<128x128xf32>
        %cst_108 = arith.constant dense<0.000000e+00> : vector<16x128xf32>
        %241 = tpu.matmul %239, %240, %cst_108 {dimension_numbers = #tpu.dot_dimension_numbers<[1], [0], [0], [1], [0, 0, 1, 1], [], []>} : vector<16x128xf32>, vector<128x128xf32>, vector<16x128xf32> -> vector<16x128xf32>
        %242 = arith.addf %241, %9 : vector<16x128xf32>
        %243 = vector.extract_strided_slice %168 {offsets = [3, 0], sizes = [1, 128], strides = [1, 1]} : vector<4x128xf32> to vector<1x128xf32>
        %244 = vector.broadcast %243 : vector<1x128xf32> to vector<16x128xf32>
        %245 = arith.addf %242, %244 : vector<16x128xf32>
        %cst_109 = arith.constant 0.000000e+00 : f32
        %246 = vector.broadcast %cst_109 : f32 to vector<16x128xf32>
        %247 = arith.maximumf %245, %246 : vector<16x128xf32>
        %c0_110 = arith.constant 0 : index
        %c0_111 = arith.constant 0 : index
        %248 = vector.load %arg9[%c0_110, %c0_111] : memref<128x1xf32, #tpu.memory_space<vmem>>, vector<128x1xf32>
        %cst_112 = arith.constant dense<0.000000e+00> : vector<16x1xf32>
        %249 = tpu.matmul %247, %248, %cst_112 {dimension_numbers = #tpu.dot_dimension_numbers<[1], [0], [0], [1], [0, 0, 1, 1], [], []>} : vector<16x128xf32>, vector<128x1xf32>, vector<16x1xf32> -> vector<16x1xf32>
        %c3_i32_113 = arith.constant 3 : i32
        %250 = vector.broadcast %c3_i32_113 : i32 to vector<1x4xi32>
        %251 = arith.cmpi eq, %10, %250 : vector<1x4xi32>
        %252 = arith.extui %251 : vector<1x4xi1> to vector<1x4xi32>
        %253 = arith.sitofp %252 : vector<1x4xi32> to vector<1x4xf32>
        %254 = vector.broadcast %249 : vector<16x1xf32> to vector<16x4xf32>
        %255 = vector.broadcast %253 : vector<1x4xf32> to vector<16x4xf32>
        %256 = arith.mulf %254, %255 : vector<16x4xf32>
        %257 = arith.addf %235, %256 : vector<16x4xf32>
        %c0_114 = arith.constant 0 : index
        %c0_115 = arith.constant 0 : index
        %258 = vector.load %arg10[%c0_114, %c0_115] : memref<1x1xf32, #tpu.memory_space<vmem>>, vector<1x1xf32>
        %259 = vector.broadcast %258 : vector<1x1xf32> to vector<16x4xf32>
        %260 = arith.addf %257, %259 : vector<16x4xf32>
        %cst_116 = arith.constant 0.000000e+00 : f32
        %261 = vector.broadcast %cst_116 : f32 to vector<16x4xf32>
        %262 = arith.subf %261, %260 : vector<16x4xf32>
        %263 = math.exp %262 : vector<16x4xf32>
        %cst_117 = arith.constant 1.000000e+00 : f32
        %264 = vector.broadcast %cst_117 : f32 to vector<16x4xf32>
        %265 = arith.addf %264, %263 : vector<16x4xf32>
        %cst_118 = arith.constant -1.000000e+00 : f32
        %266 = vector.broadcast %cst_118 : f32 to vector<16x4xf32>
        %267 = arith.divf %266, %265 : vector<16x4xf32>
        %cst_119 = arith.constant 2.000000e+01 : f32
        %268 = vector.broadcast %cst_119 : f32 to vector<16x4xf32>
        %269 = arith.mulf %267, %268 : vector<16x4xf32>
        %cst_120 = arith.constant dense<0xFF800000> : vector<16xf32>
        %270 = vector.multi_reduction <maximumf>, %269, %cst_120 [1] : vector<16x4xf32> to vector<16xf32>
        %271 = vector.shape_cast %270 : vector<16xf32> to vector<16x1xf32>
        %272 = vector.broadcast %271 : vector<16x1xf32> to vector<16x4xf32>
        %273 = arith.subf %269, %272 : vector<16x4xf32>
        %274 = math.exp %273 : vector<16x4xf32>
        %cst_121 = arith.constant dense<0.000000e+00> : vector<16xf32>
        %275 = vector.multi_reduction <add>, %274, %cst_121 [1] : vector<16x4xf32> to vector<16xf32>
        %276 = vector.shape_cast %275 : vector<16xf32> to vector<16x1xf32>
        %277 = tpu.reciprocal %276 {approx = true} : vector<16x1xf32> -> vector<16x1xf32>
        %278 = vector.broadcast %277 : vector<16x1xf32> to vector<16x4xf32>
        %279 = arith.mulf %274, %278 : vector<16x4xf32>
        %cst_122 = arith.constant dense<0.000000e+00> : vector<4xf32>
        %280 = vector.multi_reduction <add>, %279, %cst_122 [0] : vector<16x4xf32> to vector<4xf32>
        %281 = vector.shape_cast %280 : vector<4xf32> to vector<1x4xf32>
        %cst_123 = arith.constant 9.99999997E-7 : f32
        %282 = vector.broadcast %cst_123 : f32 to vector<1x4xf32>
        %283 = arith.addf %281, %282 : vector<1x4xf32>
        %284 = tpu.reciprocal %283 {approx = true} : vector<1x4xf32> -> vector<1x4xf32>
        %285 = vector.broadcast %284 : vector<1x4xf32> to vector<16x4xf32>
        %286 = arith.mulf %279, %285 : vector<16x4xf32>
        %cst_124 = arith.constant dense<0.000000e+00> : vector<4x128xf32>
        %287 = tpu.matmul %286, %0, %cst_124 {dimension_numbers = #tpu.dot_dimension_numbers<[0], [0], [1], [1], [0, 1, 1, 1], [], []>} : vector<16x4xf32>, vector<16x128xf32>, vector<4x128xf32> -> vector<4x128xf32>
        %c0_125 = arith.constant 0 : index
        %c0_126 = arith.constant 0 : index
        %288 = vector.load %arg11[%c0_125, %c0_126] : memref<4x128xf32, #tpu.memory_space<vmem>>, vector<4x128xf32>
        tpu.vector_store %arg11[%c0_125, %c0_126], %157 {strides = array<i32>} : memref<4x128xf32, #tpu.memory_space<vmem>>, vector<4x128xf32>,
        %c0_127 = arith.constant 0 : index
        %c0_128 = arith.constant 0 : index
        %289 = vector.load %arg12[%c0_127, %c0_128] : memref<16x4xf32, #tpu.memory_space<vmem>>, vector<16x4xf32>
        tpu.vector_store %arg12[%c0_127, %c0_128], %279 {strides = array<i32>} : memref<16x4xf32, #tpu.memory_space<vmem>>, vector<16x4xf32>,
        %c0_129 = arith.constant 0 : index
        %c0_130 = arith.constant 0 : index
        %290 = vector.load %arg13[%c0_129, %c0_130] : memref<4x128xf32, #tpu.memory_space<vmem>>, vector<4x128xf32>
        tpu.vector_store %arg13[%c0_129, %c0_130], %287 {strides = array<i32>} : memref<4x128xf32, #tpu.memory_space<vmem>>, vector<4x128xf32>,
        %291 = arith.subf %287, %157 : vector<4x128xf32>
        %292 = math.absf %291 : vector<4x128xf32>
        %293 = vector.shape_cast %292 : vector<4x128xf32> to vector<1x4x128xf32>
        %cst_131 = arith.constant dense<0.000000e+00> : vector<1xf32>
        %294 = vector.multi_reduction <add>, %293, %cst_131 [1, 2] : vector<1x4x128xf32> to vector<1xf32>
        %295 = vector.shape_cast %294 : vector<1xf32> to vector<1x1x1xf32>
        %296 = vector.extract %295[0, 0, 0] : f32 from vector<1x1x1xf32>
        %c0_132 = arith.constant 0 : index
        %297 = memref.load %arg14[%c0_132] : memref<1xf32, #tpu.memory_space<smem>>
        memref.store %296, %arg14[%c0_132] : memref<1xf32, #tpu.memory_space<smem>>
      } else {
      }
    }
    return
  }
}

</mosaic_0001>

<bundles_post_ra>
// kernel: query_specific_dkm_forward.1
= control target key start
LH: loop header
LB: loop body
LE: loop exit
PB: predicated region body
PF: predicated region fallthrough
CT: control target
= control target key end

     0   :  { %s5641_s0 = inlined_call_operand.vmem [shape: f32[1,128], index: 0, kind: input, shape index: {}]   ;;  %s5642_s1 = inlined_call_operand.vmem [shape: f32[16,128], index: 1, kind: input, shape index: {}]   ;;  %s5643_s2 = inlined_call_operand.vmem [shape: f32[4,128], index: 2, kind: input, shape index: {}]   ;;  %s5644_s3 = inlined_call_operand.vmem [shape: f32[128,128], index: 3, kind: input, shape index: {}]   ;;  %s5645_s4 = inlined_call_operand.vmem [shape: f32[128,128], index: 4, kind: input, shape index: {}]   ;;  %s5646_s5 = inlined_call_operand.vmem [shape: f32[128,128], index: 5, kind: input, shape index: {}]   ;;  %s5647_s6 = inlined_call_operand.vmem [shape: f32[128,128], index: 6, kind: input, shape index: {}]   ;;  %s5648_s7 = inlined_call_operand.vmem [shape: f32[128,128], index: 7, kind: input, shape index: {}]   ;;  %s5649_s8 = inlined_call_operand.vmem [shape: f32[1,128], index: 8, kind: input, shape index: {}]   ;;  %s5650_s9 = inlined_call_operand.vmem [shape: f32[128,1], index: 9, kind: input, shape index: {}]   ;;  %s5651_s10 = inlined_call_operand.<no memory space> [shape: f32[1,1], index: 10, kind: input, shape index: {}]   ;;  %s5652_s11 = inlined_call_operand.hbm [shape: f32[4,128], index: 11, kind: output, shape index: {0}]   ;;  %s5653_s12 = inlined_call_operand.vmem [shape: f32[16,4], index: 12, kind: output, shape index: {1}]  }
   0x1   :  { %v18_v0 = vstv %s5651_s10 }
   0x2   :  { %19 = vst [vmem:[#allocation4] sm:$0x1] %v18_v0 }
   0x3   :  { %20 = vsyncpa [#allocation6], 0  ;;  %v72_v1 = vld [vmem:[%s5647_s6] sm:$0xff]  ;;  %v73_v2 = vld [vmem:[%s5647_s6 + $0x8] sm:$0xff]  ;;  %v4492_v3 = vmov 0.0|0.0   ;;  %vm4493_vm0 = vmmov 0  }
   0x4   :  { %3783 = vmatprep.subr.bf16.mxu1 %v4492_v3  ;;  %v3719_v4 = vpack.c.bf16 %v73_v2, %v72_v1  ;;  %v259_v5 = vld [vmem:[%s5648_s7] sm:$0xff]  ;;  %v260_v6 = vld [vmem:[%s5648_s7 + $0x8] sm:$0xff]  ;;  %v74_v7 = vld [vmem:[%s5647_s6 + $0x10] sm:$0xff]  ;;  %v4494_v12 = vmov 0.0   ;;  %vm1213_vm5 = vcmask 31744   ;;  %vm1281_vm6 = vcmask 130048  }
   0x5   :  { %v3784_v8 = vpack.c.bf16 %v260_v6, %v259_v5  ;;  %v75_v9 = vld [vmem:[%s5647_s6 + $0x18] sm:$0xff]  ;;  %v261_v10 = vld [vmem:[%s5648_s7 + $0x10] sm:$0xff]  ;;  %3037 = vmatprep.mubr.msk.f32.mxu1 %vm4493_vm0, %v4494_v12  ;;  %v76_v14 = vld [vmem:[%s5647_s6 + $0x20] sm:$0xff]  ;;  %vm1361_vm7 = vcmask 1043456   ;;  %s5173_s29 = smov 0  }
   0x6   :  { %v262_v11 = vld [vmem:[%s5648_s7 + $0x18] sm:$0xff]  ;;  %3720 = vmatprep.subr.bf16.mxu0 %v3719_v4  ;;  %v3723_v13 = vpack.c.bf16 %v75_v9, %v74_v7  ;;  %v77_v15 = vld [vmem:[%s5647_s6 + $0x28] sm:$0xff]  ;;  %v263_v18 = vld [vmem:[%s5648_s7 + $0x20] sm:$0xff] }
   0x7   :  { %3785 = vmatpush3.bf16.msra.mxu1 %v3784_v8  ;;  %3722 = vmatpush3.bf16.msra.mxu0 %v3719_v4  ;;  %v3787_v16 = vpack.c.bf16 %v262_v11, %v261_v10  ;;  %v3727_v17 = vpack.c.bf16 %v77_v15, %v76_v14  ;;  %v264_v19 = vld [vmem:[%s5648_s7 + $0x28] sm:$0xff]  ;;  %v78_v20 = vld [vmem:[%s5647_s6 + $0x30] sm:$0xff]  ;;  %v79_v21 = vld [vmem:[%s5647_s6 + $0x38] sm:$0xff] }
   0x8   :  { %3786 = vmatprep.subr.bf16.mxu1 %v4492_v3  ;;  %3724 = vmatprep.subr.bf16.mxu0 %v3723_v13  ;;  %v3790_v22 = vpack.c.bf16 %v264_v19, %v263_v18  ;;  %v3731_v23 = vpack.c.bf16 %v79_v21, %v78_v20  ;;  %v265_v24 = vld [vmem:[%s5648_s7 + $0x30] sm:$0xff]  ;;  %v266_v25 = vld [vmem:[%s5648_s7 + $0x38] sm:$0xff]  ;;  %v80_v26 = vld [vmem:[%s5647_s6 + $0x40] sm:$0xff] }
   0x9   :  { %v81_v27 = vld [vmem:[%s5647_s6 + $0x48] sm:$0xff]  ;;  %v4631_v28 = vld [vmem:[%s5642_s1] sm:$0xff]  ;;  %v3793_v30 = vpack.c.bf16 %v266_v25, %v265_v24  ;;  %v82_v36 = vld [vmem:[%s5647_s6 + $0x50] sm:$0xff]  ;;  %v238_v25 = vlaneseq }
   0xa   :  { %v4636_v29 = vld [vmem:[%s5641_s0] ss:$0 sm:$0xff]  ;;  %v3735_v33 = vpack.c.bf16 %v81_v27, %v80_v26  ;;  %v268_v35 = vld [vmem:[%s5648_s7 + $0x48] sm:$0xff]  ;;  %v83_v37 = vld [vmem:[%s5647_s6 + $0x58] sm:$0xff] }
   0xb   :  { %3788 = vmatpush3.bf16.msra.mxu1 %v3787_v16  ;;  %3726 = vmatpush3.bf16.msra.mxu0 %v3723_v13  ;;  %v68_v31 = vsub.f32 %v4631_v28, %v4636_v29  ;;  %v4643_v32 = vld [vmem:[%s5643_s2] sm:$0xf]  ;;  %v3739_v40 = vpack.c.bf16 %v83_v37, %v82_v36  ;;  %v269_v41 = vld [vmem:[%s5648_s7 + $0x50] sm:$0xff]  ;;  %v270_v42 = vld [vmem:[%s5648_s7 + $0x58] sm:$0xff] }
   0xc   :  { %3789 = vmatprep.subr.bf16.mxu1 %v4492_v3  ;;  %3728 = vmatprep.subr.bf16.mxu0 %v3727_v17  ;;  %v267_v34 = vld [vmem:[%s5648_s7 + $0x40] sm:$0xff]  ;;  %1355 = vst [vmem:[#allocation5] sm:$0xf] %v4643_v32  ;;  %v85_v44 = vld [vmem:[%s5647_s6 + $0x68] sm:$0xff]  ;;  %v3799_v45 = vpack.c.bf16 %v270_v42, %v269_v41  ;;  %v86_v49 = vld [vmem:[%s5647_s6 + $0x70] sm:$0xff]  ;;  %v257_v58 = vsub.f32 %v4643_v32, %v4636_v29 }
   0xd   :  { %v70_v38 = vand.u32 2147483647, %v68_v31  ;;  %v3796_v39 = vpack.c.bf16 %v268_v35, %v267_v34  ;;  %v84_v43 = vld [vmem:[%s5647_s6 + $0x60] sm:$0xff]  ;;  %v272_v48 = vld [vmem:[%s5648_s7 + $0x68] sm:$0xff]  ;;  %v87_v50 = vld [vmem:[%s5647_s6 + $0x78] sm:$0xff]  ;;  %v4776_v35 = vshrl.u32 %v238_v25, 7 }
   0xe   :  { %v3743_v46 = vpack.c.bf16 %v85_v44, %v84_v43  ;;  %v271_v47 = vld [vmem:[%s5648_s7 + $0x60] sm:$0xff]  ;;  %v4688_v52 = vld [vmem:[%s5642_s1 + $0x8] sm:$0xff]  ;;  %v3747_v53 = vpack.c.bf16 %v87_v50, %v86_v49  ;;  %v273_v54 = vld [vmem:[%s5648_s7 + $0x70] sm:$0xff]  ;;  %v258_v2 = vand.u32 2147483647, %v257_v58 }
   0xf   :  { %3791 = vmatpush3.bf16.msra.mxu1 %v3790_v22  ;;  %3730 = vmatpush3.bf16.msra.mxu0 %v3727_v17  ;;  %v3802_v51 = vpack.c.bf16 %v272_v48, %v271_v47  ;;  %v274_v55 = vld [vmem:[%s5648_s7 + $0x78] sm:$0xff]  ;;  %v46_v56 = vld [vmem:[%s5644_s3] sm:$0xff]  ;;  %v47_v57 = vld [vmem:[%s5644_s3 + $0x8] sm:$0xff]  ;;  %v69_v59 = vsub.f32 %v4688_v52, %v4636_v29  ;;  %v4792_v42 = vsub.s32 0, %v4776_v35 }
  0x10   :  { %3792 = vmatprep.subr.bf16.mxu1 %v4492_v3  ;;  %3732 = vmatprep.subr.bf16.mxu0 %v3731_v23  ;;  %v3805_v60 = vpack.c.bf16 %v274_v55, %v273_v54  ;;  %v3751_v61 = vpack.c.bf16 %v47_v57, %v46_v56  ;;  %v241_v62 = vld [vmem:[%s5645_s4] sm:$0xff]  ;;  %v242_v63 = vld [vmem:[%s5645_s4 + $0x8] sm:$0xff]  ;;  %v48_v0 = vld [vmem:[%s5644_s3 + $0x10] sm:$0xff] }
  0x11   :  { %2967 = vmatprep.mubr.f32.mxu0 %v70_v38  ;;  %v49_v1 = vld [vmem:[%s5644_s3 + $0x18] sm:$0xff]  ;;  %v71_v4 = vand.u32 2147483647, %v69_v59  ;;  %v3808_v5 = vpack.c.bf16 %v242_v63, %v241_v62  ;;  %v243_v7 = vld [vmem:[%s5645_s4 + $0x10] sm:$0xff]  ;;  %v50_v9 = vld [vmem:[%s5644_s3 + $0x20] sm:$0xff]  ;;  %v426_v49 = vrot.slane %v4643_v32, %v4792_v42 }
  0x12   :  { %v3755_v6 = vpack.c.bf16 %v49_v1, %v48_v0  ;;  %v244_v8 = vld [vmem:[%s5645_s4 + $0x18] sm:$0xff]  ;;  %v51_v10 = vld [vmem:[%s5644_s3 + $0x28] sm:$0xff]  ;;  %v245_v14 = vld [vmem:[%s5645_s4 + $0x20] sm:$0xff] }
  0x13   :  { %3794 = vmatpush3.bf16.msra.mxu1 %v3793_v30  ;;  %3734 = vmatpush3.bf16.msra.mxu0 %v3731_v23  ;;  %v3811_v11 = vpack.c.bf16 %v244_v8, %v243_v7  ;;  %v3759_v13 = vpack.c.bf16 %v51_v10, %v50_v9  ;;  %v246_v15 = vld [vmem:[%s5645_s4 + $0x28] sm:$0xff]  ;;  %v52_v16 = vld [vmem:[%s5644_s3 + $0x30] sm:$0xff]  ;;  %v53_v17 = vld [vmem:[%s5644_s3 + $0x38] sm:$0xff]  ;;  %v427_v57 = vsub.f32 %v4631_v28, %v426_v49 }
  0x14   :  { %3795 = vmatprep.subr.bf16.mxu1 %v4492_v3  ;;  %3736 = vmatprep.subr.bf16.mxu0 %v3735_v33  ;;  %v3814_v18 = vpack.c.bf16 %v246_v15, %v245_v14  ;;  %v3763_v19 = vpack.c.bf16 %v53_v17, %v52_v16  ;;  %v247_v20 = vld [vmem:[%s5645_s4 + $0x30] sm:$0xff]  ;;  %v248_v21 = vld [vmem:[%s5645_s4 + $0x38] sm:$0xff]  ;;  %v54_v22 = vld [vmem:[%s5644_s3 + $0x40] sm:$0xff]  ;;  %v4885_v15 = vsub.s32 1, %v4776_v35 }
  0x15   :  { %v55_v23 = vld [vmem:[%s5644_s3 + $0x48] sm:$0xff]  ;;  %v3817_v24 = vpack.c.bf16 %v248_v21, %v247_v20  ;;  %v249_v27 = vld [vmem:[%s5645_s4 + $0x40] sm:$0xff]  ;;  %v56_v31 = vld [vmem:[%s5644_s3 + $0x50] sm:$0xff]  ;;  %v428_v21 = vsub.f32 %v4688_v52, %v426_v49 }
  0x16   :  { %v3767_v26 = vpack.c.bf16 %v55_v23, %v54_v22  ;;  %v250_v30 = vld [vmem:[%s5645_s4 + $0x48] sm:$0xff]  ;;  %v251_v37 = vld [vmem:[%s5645_s4 + $0x50] sm:$0xff]  ;;  %v252_v38 = vld [vmem:[%s5645_s4 + $0x58] sm:$0xff] }
  0x17   :  { %3797 = vmatpush3.bf16.msra.mxu1 %v3796_v39  ;;  %3738 = vmatpush3.bf16.msra.mxu0 %v3735_v33  ;;  %v57_v33 = vld [vmem:[%s5644_s3 + $0x58] sm:$0xff]  ;;  %v3820_v34 = vpack.c.bf16 %v250_v30, %v249_v27  ;;  %v58_v39 = vld [vmem:[%s5644_s3 + $0x60] sm:$0xff]  ;;  %v3823_v41 = vpack.c.bf16 %v252_v38, %v251_v37  ;;  %v432_v55 = vld [vmem:[%s5646_s5 + $0x8] sm:$0xff]  ;;  %v430_v23 = vand.u32 2147483647, %v428_v21 }
  0x18   :  { %3798 = vmatprep.subr.bf16.mxu1 %v4492_v3  ;;  %3740 = vmatprep.subr.bf16.mxu0 %v3739_v40  ;;  %v3771_v36 = vpack.c.bf16 %v57_v33, %v56_v31  ;;  %v253_v44 = vld [vmem:[%s5645_s4 + $0x60] sm:$0xff]  ;;  %v61_v47 = vld [vmem:[%s5644_s3 + $0x78] sm:$0xff]  ;;  %v433_v59 = vld [vmem:[%s5646_s5 + $0x10] sm:$0xff] }
  0x19   :  { %v431_v54 = vld [vmem:[%s5646_s5] sm:$0xff]  ;;  %v436_v0 = vld [vmem:[%s5646_s5 + $0x28] sm:$0xff]  ;;  %v441_v9 = vld [vmem:[%s5646_s5 + $0x50] sm:$0xff] }
  0x1a   :  { %v4824_v58 = vpack.c.bf16 %v432_v55, %v431_v54  ;;  %v435_v63 = vld [vmem:[%s5646_s5 + $0x20] sm:$0xff]  ;;  %v440_v7 = vld [vmem:[%s5646_s5 + $0x48] sm:$0xff]  ;;  %v442_v10 = vld [vmem:[%s5646_s5 + $0x58] sm:$0xff] }
  0x1b   :  { %3800 = vmatpush3.bf16.msra.mxu1 %v3799_v45  ;;  %3742 = vmatpush3.bf16.msra.mxu0 %v3739_v40  ;;  %v59_v40 = vld [vmem:[%s5644_s3 + $0x68] sm:$0xff]  ;;  %v4845_v1 = vpack.c.bf16 %v436_v0, %v435_v63  ;;  %v445_v17 = vld [vmem:[%s5646_s5 + $0x70] sm:$0xff]  ;;  %v530_v38 = vld [vmem:[%s5650_s9] sm:$0xff] }
  0x1c   :  { %3801 = vmatprep.subr.bf16.mxu1 %v4492_v3  ;;  %3744 = vmatprep.subr.bf16.mxu0 %v3743_v46  ;;  %v3775_v43 = vpack.c.bf16 %v59_v40, %v58_v39  ;;  %v254_v45 = vld [vmem:[%s5645_s4 + $0x68] sm:$0xff]  ;;  %v538_v55 = vld [vmem:[%s5650_s9 + $0x40] sm:$0xff]  ;;  %v544_v0 = vld [vmem:[%s5650_s9 + $0x70] sm:$0xff] }
  0x1d   :  { %v3826_v48 = vpack.c.bf16 %v254_v45, %v253_v44  ;;  %v444_v14 = vld [vmem:[%s5646_s5 + $0x68] sm:$0xff]  ;;  %v534_v45 = vld [vmem:[%s5650_s9 + $0x20] sm:$0xff] }
  0x1e   :  { %v531_v39 = vld [vmem:[%s5650_s9 + $0x8] sm:$0xff] }
  0x1f   :  { %3803 = vmatpush3.bf16.msra.mxu1 %v3802_v51  ;;  %3746 = vmatpush3.bf16.msra.mxu0 %v3743_v46  ;;  %v60_v46 = vld [vmem:[%s5644_s3 + $0x70] sm:$0xff]  ;;  %v4959_v40 = vpack.c.bf16 %v531_v39, %v530_v38 }
  0x20   :  { %3804 = vmatprep.subr.bf16.mxu1 %v4492_v3  ;;  %3748 = vmatprep.subr.bf16.mxu0 %v3747_v53  ;;  %v3779_v50 = vpack.c.bf16 %v61_v47, %v60_v46  ;;  %v255_v51 = vld [vmem:[%s5645_s4 + $0x70] sm:$0xff]  ;;  %v535_v46 = vld [vmem:[%s5650_s9 + $0x28] sm:$0xff] }
  0x23   :  { %3806 = vmatpush3.bf16.msra.mxu1 %v3805_v60  ;;  %3750 = vmatpush3.bf16.msra.mxu0 %v3747_v53  ;;  %v256_v53 = vld [vmem:[%s5645_s4 + $0x78] sm:$0xff] }
  0x24   :  { %3807 = vmatprep.subr.bf16.mxu1 %v4492_v3  ;;  %3752 = vmatprep.subr.bf16.mxu0 %v3751_v61  ;;  %v3829_v56 = vpack.c.bf16 %v256_v53, %v255_v51  ;;  %v434_v60 = vld [vmem:[%s5646_s5 + $0x18] sm:$0xff] }
  0x25   :  { %v4833_v62 = vpack.c.bf16 %v434_v60, %v433_v59  ;;  %v537_v51 = vld [vmem:[%s5650_s9 + $0x38] sm:$0xff]  ;;  %v540_v59 = vld [vmem:[%s5650_s9 + $0x50] sm:$0xff] }
  0x26   :  { %3038 = vmatmul.mubr.f32.vlgmr.msra.gmra.mrb[0].mxu1 %v258_v2  ;;  %2968 = vmatmul.mubr.f32.vlgmr.msra.gmra.mrb[0].mxu0 %v71_v4  ;;  %v437_v2 = vld [vmem:[%s5646_s5 + $0x30] sm:$0xff]  ;;  %v438_v4 = vld [vmem:[%s5646_s5 + $0x38] sm:$0xff] }
  0x27   :  { %3809 = vmatpush3.bf16.msra.mxu1 %v3808_v5  ;;  %3754 = vmatpush3.bf16.msra.mxu0 %v3751_v61  ;;  %v429_v61 = vand.u32 2147483647, %v427_v57  ;;  %v4855_v5 = vpack.c.bf16 %v438_v4, %v437_v2  ;;  %v541_v60 = vld [vmem:[%s5650_s9 + $0x58] sm:$0xff] }
  0x28   :  { %3810 = vmatprep.subr.bf16.mxu1 %v4492_v3  ;;  %3756 = vmatprep.subr.bf16.mxu0 %v3755_v6 }
  0x29   :  { %3072 = vmatprep.mubr.msk.f32.mxu1 %vm4493_vm0, %v4494_v12  ;;  %3002 = vmatprep.mubr.f32.mxu0 %v4631_v28 }
  0x2b   :  { %3812 = vmatpush3.bf16.msra.mxu1 %v3811_v11  ;;  %3758 = vmatpush3.bf16.msra.mxu0 %v3755_v6  ;;  %v439_v6 = vld [vmem:[%s5646_s5 + $0x40] sm:$0xff]  ;;  %v4875_v11 = vpack.c.bf16 %v442_v10, %v441_v9 }
  0x2c   :  { %3813 = vmatprep.subr.bf16.mxu1 %v4492_v3  ;;  %3760 = vmatprep.subr.bf16.mxu0 %v3759_v13  ;;  %v4865_v8 = vpack.c.bf16 %v440_v7, %v439_v6 }
  0x2f   :  { %3815 = vmatpush3.bf16.msra.mxu1 %v3814_v18  ;;  %3762 = vmatpush3.bf16.msra.mxu0 %v3759_v13  ;;  %v443_v13 = vld [vmem:[%s5646_s5 + $0x60] sm:$0xff]  ;;  %v446_v18 = vld [vmem:[%s5646_s5 + $0x78] sm:$0xff] }
  0x30   :  { %3816 = vmatprep.subr.bf16.mxu1 %v4492_v3  ;;  %3764 = vmatprep.subr.bf16.mxu0 %v3763_v19  ;;  %v4888_v16 = vpack.c.bf16 %v444_v14, %v443_v13  ;;  %v4900_v20 = vpack.c.bf16 %v446_v18, %v445_v17  ;;  %v4495_v14 = vmov 0  }
  0x31   :  { %4420 = vset.pattern.permute.xlu0 %v4495_v14  ;;  %4421 = vset.pattern.permute.xlu1 %v4495_v14 }
  0x33   :  { %3818 = vmatpush3.bf16.msra.mxu1 %v3817_v24  ;;  %3766 = vmatpush3.bf16.msra.mxu0 %v3763_v19  ;;  %v641_v19 = vrot.slane %v4643_v32, %v4885_v15 }
  0x34   :  { %3819 = vmatprep.subr.bf16.mxu1 %v4492_v3  ;;  %3768 = vmatprep.subr.bf16.mxu0 %v3767_v26 }
  0x35   :  { %v642_v22 = vsub.f32 %v4631_v28, %v641_v19  ;;  %v643_v30 = vsub.f32 %v4688_v52, %v641_v19 }
  0x37   :  { %3821 = vmatpush3.bf16.msra.mxu1 %v3820_v34  ;;  %3770 = vmatpush3.bf16.msra.mxu0 %v3767_v26  ;;  %v644_v24 = vand.u32 2147483647, %v642_v22  ;;  %v4918_v26 = vsub.s32 2, %v4776_v35  ;;  %v645_v33 = vand.u32 2147483647, %v643_v30 }
  0x38   :  { %3822 = vmatprep.subr.bf16.mxu1 %v4492_v3  ;;  %3772 = vmatprep.subr.bf16.mxu0 %v3771_v36 }
  0x39   :  { %v824_v27 = vrot.slane %v4643_v32, %v4918_v26 }
  0x3b   :  { %3824 = vmatpush3.bf16.msra.mxu1 %v3823_v41  ;;  %3774 = vmatpush3.bf16.msra.mxu0 %v3771_v36  ;;  %v825_v31 = vsub.f32 %v4631_v28, %v824_v27  ;;  %v4941_v36 = vsub.s32 3, %v4776_v35  ;;  %v532_v35 = vld [vmem:[%s5650_s9 + $0x10] sm:$0xff]  ;;  %v533_v41 = vld [vmem:[%s5650_s9 + $0x18] sm:$0xff] }
  0x3c   :  { %3825 = vmatprep.subr.bf16.mxu1 %v4492_v3  ;;  %3776 = vmatprep.subr.bf16.mxu0 %v3775_v43  ;;  %v4965_v44 = vpack.c.bf16 %v533_v41, %v532_v35 }
  0x3d   :  { %v827_v34 = vand.u32 2147483647, %v825_v31  ;;  %v4947_v37 = vrot.slane %v4643_v32, %v4941_v36 }
  0x3f   :  { %3827 = vmatpush3.bf16.msra.mxu1 %v3826_v48  ;;  %3778 = vmatpush3.bf16.msra.mxu0 %v3775_v43  ;;  %v826_v43 = vsub.f32 %v4688_v52, %v824_v27  ;;  %v1008_v47 = vsub.f32 %v4631_v28, %v4947_v37  ;;  %v4980_v48 = vpack.c.bf16 %v535_v46, %v534_v45 }
  0x40   :  { %3828 = vmatprep.subr.bf16.mxu1 %v4492_v3  ;;  %3780 = vmatprep.subr.bf16.mxu0 %v3779_v50  ;;  %v1009_v4 = vsub.f32 %v4688_v52, %v4947_v37 }
  0x41   :  { %v828_v49 = vand.u32 2147483647, %v826_v43  ;;  %v1010_v53 = vand.u32 2147483647, %v1008_v47 }
  0x43   :  { %3830 = vmatpush3.bf16.msra.mxu1 %v3829_v56  ;;  %3782 = vmatpush3.bf16.msra.mxu0 %v3779_v50  ;;  %v536_v50 = vld [vmem:[%s5650_s9 + $0x30] sm:$0xff]  ;;  %v539_v56 = vld [vmem:[%s5650_s9 + $0x48] sm:$0xff] }
  0x44   :  { %3832 = vmatprep.subr.bf16.mxu0 %v4824_v58  ;;  %3864 = vmatprep.subr.bf16.mxu1 %v4959_v40  ;;  %v4992_v54 = vpack.c.bf16 %v537_v51, %v536_v50  ;;  %v5004_v57 = vpack.c.bf16 %v539_v56, %v538_v55 }
  0x46   :  { %3073 = vmatmul.mubr.f32.vlgmr.msra.gmra.mrb[2].mxu1 %v4643_v32  ;;  %3003 = vmatmul.mubr.f32.vlgmr.msra.gmra.mrb[0].mxu0 %v4688_v52 }
  0x47   :  { %3834 = vmatpush3.bf16.msra.mxu0 %v4824_v58  ;;  %3107 = vmatprep.mubr.f32.mxu0 %v429_v61  ;;  %v542_v61 = vld [vmem:[%s5650_s9 + $0x60] sm:$0xff] }
  0x48   :  { %3836 = vmatprep.subr.bf16.mxu0 %v4833_v62  ;;  %3866 = vmatpush3.bf16.msra.mxu1 %v4959_v40 }
  0x49   :  { %3868 = vmatprep.subr.bf16.mxu1 %v4965_v44 }
  0x4b   :  { %3838 = vmatpush3.bf16.msra.mxu0 %v4833_v62 }
  0x4c   :  { %3840 = vmatprep.subr.bf16.mxu0 %v4845_v1  ;;  %3870 = vmatpush3.bf16.msra.mxu1 %v4965_v44 }
  0x4d   :  { %3872 = vmatprep.subr.bf16.mxu1 %v4980_v48 }
  0x4f   :  { %3842 = vmatpush3.bf16.msra.mxu0 %v4845_v1 }
  0x50   :  { %3844 = vmatprep.subr.bf16.mxu0 %v4855_v5  ;;  %3874 = vmatpush3.bf16.msra.mxu1 %v4980_v48 }
  0x51   :  { %3876 = vmatprep.subr.bf16.mxu1 %v4992_v54 }
  0x53   :  { %3846 = vmatpush3.bf16.msra.mxu0 %v4855_v5 }
  0x54   :  { %3848 = vmatprep.subr.bf16.mxu0 %v4865_v8  ;;  %3878 = vmatpush3.bf16.msra.mxu1 %v4992_v54 }
  0x55   :  { %3880 = vmatprep.subr.bf16.mxu1 %v5004_v57 }
  0x57   :  { %3850 = vmatpush3.bf16.msra.mxu0 %v4865_v8 }
  0x58   :  { %3852 = vmatprep.subr.bf16.mxu0 %v4875_v11  ;;  %3882 = vmatpush3.bf16.msra.mxu1 %v5004_v57 }
  0x5b   :  { %3854 = vmatpush3.bf16.msra.mxu0 %v4875_v11 }
  0x5c   :  { %3856 = vmatprep.subr.bf16.mxu0 %v4888_v16 }
  0x5f   :  { %3858 = vmatpush3.bf16.msra.mxu0 %v4888_v16 }
  0x60   :  { %3860 = vmatprep.subr.bf16.mxu0 %v4900_v20 }
  0x63   :  { %3862 = vmatpush3.bf16.msra.mxu0 %v4900_v20 }
  0x64   :  { %3896 = vmatprep.subr.bf16.mxu0 %v4824_v58 }
  0x66   :  { %3108 = vmatmul.mubr.f32.vlgmr.msra.gmra.mrb[2].mxu0 %v430_v23 }
  0x67   :  { %3898 = vmatpush3.bf16.msra.mxu0 %v4824_v58  ;;  %3177 = vmatprep.mubr.f32.mxu0 %v644_v24 }
  0x68   :  { %3900 = vmatprep.subr.bf16.mxu0 %v4833_v62 }
  0x6b   :  { %3902 = vmatpush3.bf16.msra.mxu0 %v4833_v62 }
  0x6c   :  { %3904 = vmatprep.subr.bf16.mxu0 %v4845_v1 }
  0x6f   :  { %3906 = vmatpush3.bf16.msra.mxu0 %v4845_v1 }
  0x70   :  { %3908 = vmatprep.subr.bf16.mxu0 %v4855_v5 }
  0x73   :  { %3910 = vmatpush3.bf16.msra.mxu0 %v4855_v5 }
  0x74   :  { %3912 = vmatprep.subr.bf16.mxu0 %v4865_v8 }
  0x77   :  { %3914 = vmatpush3.bf16.msra.mxu0 %v4865_v8 }
  0x78   :  { %3916 = vmatprep.subr.bf16.mxu0 %v4875_v11 }
  0x7b   :  { %3918 = vmatpush3.bf16.msra.mxu0 %v4875_v11 }
  0x7c   :  { %3920 = vmatprep.subr.bf16.mxu0 %v4888_v16 }
  0x7f   :  { %3922 = vmatpush3.bf16.msra.mxu0 %v4888_v16 }
  0x80   :  { %3924 = vmatprep.subr.bf16.mxu0 %v4900_v20 }
  0x83   :  { %3926 = vmatpush3.bf16.msra.mxu0 %v4900_v20 }
  0x84   :  { %3960 = vmatprep.subr.bf16.mxu0 %v4824_v58 }
  0x86   :  { %3178 = vmatmul.mubr.f32.vlgmr.msra.gmra.mrb[4].mxu0 %v645_v33 }
  0x87   :  { %3962 = vmatpush3.bf16.msra.mxu0 %v4824_v58  ;;  %3247 = vmatprep.mubr.f32.mxu0 %v827_v34 }
  0x88   :  { %3964 = vmatprep.subr.bf16.mxu0 %v4833_v62 }
  0x8b   :  { %3966 = vmatpush3.bf16.msra.mxu0 %v4833_v62 }
  0x8c   :  { %3968 = vmatprep.subr.bf16.mxu0 %v4845_v1 }
  0x8f   :  { %3970 = vmatpush3.bf16.msra.mxu0 %v4845_v1 }
  0x90   :  { %3972 = vmatprep.subr.bf16.mxu0 %v4855_v5 }
  0x93   :  { %3974 = vmatpush3.bf16.msra.mxu0 %v4855_v5 }
  0x94   :  { %3976 = vmatprep.subr.bf16.mxu0 %v4865_v8 }
  0x97   :  { %3978 = vmatpush3.bf16.msra.mxu0 %v4865_v8 }
  0x98   :  { %3980 = vmatprep.subr.bf16.mxu0 %v4875_v11 }
  0x9b   :  { %3982 = vmatpush3.bf16.msra.mxu0 %v4875_v11 }
  0x9c   :  { %3984 = vmatprep.subr.bf16.mxu0 %v4888_v16 }
  0x9f   :  { %3986 = vmatpush3.bf16.msra.mxu0 %v4888_v16 }
  0xa0   :  { %3988 = vmatprep.subr.bf16.mxu0 %v4900_v20 }
  0xa3   :  { %3990 = vmatpush3.bf16.msra.mxu0 %v4900_v20 }
  0xa4   :  { %4024 = vmatprep.subr.bf16.mxu0 %v4824_v58 }
  0xa6   :  { %3248 = vmatmul.mubr.f32.vlgmr.msra.gmra.mrb[6].mxu0 %v828_v49 }
  0xa7   :  { %4026 = vmatpush3.bf16.msra.mxu0 %v4824_v58  ;;  %3317 = vmatprep.mubr.f32.mxu0 %v1010_v53  ;;  %v5016_v58 = vpack.c.bf16 %v541_v60, %v540_v59 }
  0xa8   :  { %4028 = vmatprep.subr.bf16.mxu0 %v4833_v62 }
  0xa9   :  { %3884 = vmatprep.subr.bf16.mxu1 %v5016_v58 }
  0xaa   :  { %3886 = vmatpush3.bf16.msra.mxu1 %v5016_v58 }
  0xab   :  { %4030 = vmatpush3.bf16.msra.mxu0 %v4833_v62  ;;  %v543_v62 = vld [vmem:[%s5650_s9 + $0x68] sm:$0xff] }
  0xac   :  { %4032 = vmatprep.subr.bf16.mxu0 %v4845_v1  ;;  %v5033_v63 = vpack.c.bf16 %v543_v62, %v542_v61 }
  0xae   :  { %3888 = vmatprep.subr.bf16.mxu1 %v5033_v63 }
  0xaf   :  { %4034 = vmatpush3.bf16.msra.mxu0 %v4845_v1  ;;  %3890 = vmatpush3.bf16.msra.mxu1 %v5033_v63  ;;  %v545_v1 = vld [vmem:[%s5650_s9 + $0x78] sm:$0xff] }
  0xb0   :  { %4036 = vmatprep.subr.bf16.mxu0 %v4855_v5  ;;  %v5045_v2 = vpack.c.bf16 %v545_v1, %v544_v0 }
  0xb2   :  { %3892 = vmatprep.subr.bf16.mxu1 %v5045_v2 }
  0xb3   :  { %4038 = vmatpush3.bf16.msra.mxu0 %v4855_v5  ;;  %3894 = vmatpush3.bf16.msra.mxu1 %v5045_v2  ;;  %v1011_v5 = vand.u32 2147483647, %v1009_v4 }
  0xb4   :  { %4040 = vmatprep.subr.bf16.mxu0 %v4865_v8  ;;  %3928 = vmatprep.subr.bf16.mxu1 %v4959_v40 }
  0xb7   :  { %4042 = vmatpush3.bf16.msra.mxu0 %v4865_v8 }
  0xb8   :  { %4044 = vmatprep.subr.bf16.mxu0 %v4875_v11 }
  0xbb   :  { %4046 = vmatpush3.bf16.msra.mxu0 %v4875_v11 }
  0xbc   :  { %4048 = vmatprep.subr.bf16.mxu0 %v4888_v16 }
  0xbf   :  { %4050 = vmatpush3.bf16.msra.mxu0 %v4888_v16 }
  0xc0   :  { %4052 = vmatprep.subr.bf16.mxu0 %v4900_v20 }
  0xc3   :  { %4054 = vmatpush3.bf16.msra.mxu0 %v4900_v20 }
  0xc4   :  { %4087 = vmatprep.subr.bf16.mxu0 %v4492_v3  ;;  %v2527_v3 = vld [vmem:[%s5649_s8] ss:$0 sm:$0xff] }
  0xc6   :  { %3318 = vmatmul.mubr.f32.vlgmr.msra.gmra.mrb[8].mxu0 %v1011_v5 }
  0xc7   :  { %3359 = vmatprep.mubr.msk.f32.mxu0 %vm4493_vm0, %v4494_v12 }
  0xf9   :  { %v341_v6 = vpop.f32.mrb[0].mxu1 }
  0xfa   :  { %v3039_v7 = vpop.f32.mrb[1].mxu1 }
 0x119   :  { %v411_v8 = vpop.f32.mrb[2].mxu1  ;;  %v5058_v9 = vpop.f32.mrb[0].mxu0 }
 0x11a   :  { %v412_v10 = vadd.f32 %v411_v8, %v341_v6  ;;  %v5060_v11 = vpop.f32.mrb[1].mxu0  ;;  %v3074_v13 = vpop.f32.mrb[3].mxu1 }
 0x11c   :  { %v5065_v16 = vadd.f32 %v2527_v3, %v412_v10  ;;  %v239_v10 = vand.u32 127, %v238_v25 }
 0x11e   :  { %v525_v19 = vrot.slane %v5065_v16, %v4792_v42  ;;  %v724_v33 = vrot.slane %v5065_v16, %v4885_v15  ;;  %v907_v46 = vrot.slane %v5065_v16, %v4918_v26  ;;  %vm804_vm1 = vcmp.eq.s32.totalorder %v239_v10, 1 }
 0x11f   :  { %vm621_vm2 = vcmp.eq.s32.totalorder %v239_v10, 0  ;;  %vm987_vm3 = vcmp.eq.s32.totalorder %v239_v10, 2  ;;  %v5132_v3 = vsel %vm804_vm1, 1.0, %v4494_v12  ;;  %vm1170_vm4 = vcmp.eq.s32.totalorder %v239_v10, 3 }
 0x120   :  { %v5157_v10 = vpack.c.bf16 %v4688_v52, %v4631_v28 }
 0x122   :  { %4089 = vmatpush3.bf16.msra.mxu0 %v5157_v10 }
 0x139   :  { %v3109_v17 = vpop.f32.mrb[2].mxu0 }
 0x13a   :  { %v519_v18 = vadd.f32 %v3109_v17, %v5058_v9  ;;  %v513_v20 = vpop.f32.mrb[3].mxu0  ;;  %v5138_v17 = vsel %vm987_vm3, 1.0, %v4494_v12 }
 0x13b   :  { %v514_v21 = vadd.f32 %v513_v20, %v5060_v11 }
 0x13c   :  { %v527_v22 = vadd.f32 %v525_v19, %v519_v18 }
 0x13d   :  { %v526_v23 = vadd.f32 %v525_v19, %v514_v21 }
 0x13e   :  { %v529_v27 = vmax.f32 %v527_v22, 0.0 }
 0x13f   :  { %v528_v24 = vmax.f32 %v526_v23, 0.0 }
 0x141   :  { %3142 = vmatprep.mubr.f32.mxu1 %v528_v24 }
 0x142   :  { %3143 = vmatmul.mubr.f32.vlgmr.msra.gmra.mrb[4].mxu1 %v529_v27  ;;  %v5147_v27 = vsel %vm1170_vm4, 1.0, %v4494_v12 }
 0x143   :  { %3930 = vmatpush3.bf16.msra.mxu1 %v4959_v40 }
 0x144   :  { %3932 = vmatprep.subr.bf16.mxu1 %v4965_v44 }
 0x147   :  { %3934 = vmatpush3.bf16.msra.mxu1 %v4965_v44 }
 0x148   :  { %3936 = vmatprep.subr.bf16.mxu1 %v4980_v48 }
 0x14b   :  { %3938 = vmatpush3.bf16.msra.mxu1 %v4980_v48 }
 0x14c   :  { %3940 = vmatprep.subr.bf16.mxu1 %v4992_v54 }
 0x14f   :  { %3942 = vmatpush3.bf16.msra.mxu1 %v4992_v54 }
 0x150   :  { %3944 = vmatprep.subr.bf16.mxu1 %v5004_v57 }
 0x153   :  { %3946 = vmatpush3.bf16.msra.mxu1 %v5004_v57 }
 0x154   :  { %3948 = vmatprep.subr.bf16.mxu1 %v5016_v58 }
 0x157   :  { %3950 = vmatpush3.bf16.msra.mxu1 %v5016_v58 }
 0x158   :  { %3952 = vmatprep.subr.bf16.mxu1 %v5033_v63 }
 0x159   :  { %v3179_v30 = vpop.f32.mrb[4].mxu0 }
 0x15a   :  { %v718_v31 = vadd.f32 %v3179_v30, %v5058_v9  ;;  %v712_v34 = vpop.f32.mrb[5].mxu0 }
 0x15b   :  { %v713_v37 = vadd.f32 %v712_v34, %v5060_v11  ;;  %3954 = vmatpush3.bf16.msra.mxu1 %v5033_v63 }
 0x15c   :  { %v726_v38 = vadd.f32 %v724_v33, %v718_v31  ;;  %3956 = vmatprep.subr.bf16.mxu1 %v5045_v2 }
 0x15d   :  { %v725_v39 = vadd.f32 %v724_v33, %v713_v37 }
 0x15e   :  { %v728_v41 = vmax.f32 %v726_v38, 0.0 }
 0x15f   :  { %v727_v35 = vmax.f32 %v725_v39, 0.0  ;;  %3958 = vmatpush3.bf16.msra.mxu1 %v5045_v2 }
 0x160   :  { %3992 = vmatprep.subr.bf16.mxu1 %v4959_v40 }
 0x161   :  { %3212 = vmatprep.mubr.f32.mxu1 %v727_v35 }
 0x162   :  { %3213 = vmatmul.mubr.f32.vlgmr.msra.gmra.mrb[6].mxu1 %v728_v41 }
 0x163   :  { %3994 = vmatpush3.bf16.msra.mxu1 %v4959_v40 }
 0x164   :  { %3996 = vmatprep.subr.bf16.mxu1 %v4965_v44 }
 0x167   :  { %3998 = vmatpush3.bf16.msra.mxu1 %v4965_v44 }
 0x168   :  { %4000 = vmatprep.subr.bf16.mxu1 %v4980_v48 }
 0x16b   :  { %4002 = vmatpush3.bf16.msra.mxu1 %v4980_v48 }
 0x16c   :  { %4004 = vmatprep.subr.bf16.mxu1 %v4992_v54 }
 0x16f   :  { %4006 = vmatpush3.bf16.msra.mxu1 %v4992_v54 }
 0x170   :  { %4008 = vmatprep.subr.bf16.mxu1 %v5004_v57 }
 0x173   :  { %4010 = vmatpush3.bf16.msra.mxu1 %v5004_v57 }
 0x174   :  { %4012 = vmatprep.subr.bf16.mxu1 %v5016_v58 }
 0x177   :  { %4014 = vmatpush3.bf16.msra.mxu1 %v5016_v58 }
 0x178   :  { %4016 = vmatprep.subr.bf16.mxu1 %v5033_v63 }
 0x179   :  { %v3249_v43 = vpop.f32.mrb[6].mxu0 }
 0x17a   :  { %v901_v45 = vadd.f32 %v3249_v43, %v5058_v9  ;;  %v895_v47 = vpop.f32.mrb[7].mxu0 }
 0x17b   :  { %v896_v49 = vadd.f32 %v895_v47, %v5060_v11  ;;  %4018 = vmatpush3.bf16.msra.mxu1 %v5033_v63 }
 0x17c   :  { %v909_v50 = vadd.f32 %v907_v46, %v901_v45  ;;  %4020 = vmatprep.subr.bf16.mxu1 %v5045_v2 }
 0x17d   :  { %v908_v51 = vadd.f32 %v907_v46, %v896_v49 }
 0x17e   :  { %v911_v55 = vmax.f32 %v909_v50, 0.0 }
 0x17f   :  { %v910_v53 = vmax.f32 %v908_v51, 0.0  ;;  %4022 = vmatpush3.bf16.msra.mxu1 %v5045_v2 }
 0x180   :  { %4056 = vmatprep.subr.bf16.mxu1 %v4959_v40 }
 0x181   :  { %3282 = vmatprep.mubr.f32.mxu1 %v910_v53 }
 0x182   :  { %3283 = vmatmul.mubr.f32.vlgmr.msra.gmra.mrb[8].mxu1 %v911_v55 }
 0x183   :  { %4058 = vmatpush3.bf16.msra.mxu1 %v4959_v40 }
 0x184   :  { %4060 = vmatprep.subr.bf16.mxu1 %v4965_v44 }
 0x187   :  { %4062 = vmatpush3.bf16.msra.mxu1 %v4965_v44 }
 0x188   :  { %4064 = vmatprep.subr.bf16.mxu1 %v4980_v48 }
 0x18b   :  { %4066 = vmatpush3.bf16.msra.mxu1 %v4980_v48  ;;  %v1090_v48 = vrot.slane %v5065_v16, %v4941_v36  ;;  %v5135_v16 = vsel %vm621_vm2, 1.0, %v4494_v12 }
 0x18c   :  { %4068 = vmatprep.subr.bf16.mxu1 %v4992_v54 }
 0x18f   :  { %4070 = vmatpush3.bf16.msra.mxu1 %v4992_v54 }
 0x190   :  { %4072 = vmatprep.subr.bf16.mxu1 %v5004_v57 }
 0x193   :  { %4074 = vmatpush3.bf16.msra.mxu1 %v5004_v57 }
 0x194   :  { %4076 = vmatprep.subr.bf16.mxu1 %v5016_v58 }
 0x197   :  { %4078 = vmatpush3.bf16.msra.mxu1 %v5016_v58 }
 0x198   :  { %4080 = vmatprep.subr.bf16.mxu1 %v5033_v63 }
 0x199   :  { %v3319_v40 = vpop.f32.mrb[8].mxu0 }
 0x19a   :  { %v1084_v44 = vadd.f32 %v3319_v40, %v5058_v9  ;;  %v1078_v56 = vpop.f32.mrb[9].mxu0 }
 0x19b   :  { %v1079_v59 = vadd.f32 %v1078_v56, %v5060_v11  ;;  %4082 = vmatpush3.bf16.msra.mxu1 %v5033_v63 }
 0x19c   :  { %v1092_v54 = vadd.f32 %v1090_v48, %v1084_v44  ;;  %4084 = vmatprep.subr.bf16.mxu1 %v5045_v2 }
 0x19d   :  { %v1091_v57 = vadd.f32 %v1090_v48, %v1079_v59 }
 0x19e   :  { %v1094_v58 = vmax.f32 %v1092_v54, 0.0 }
 0x19f   :  { %v1093_v60 = vmax.f32 %v1091_v57, 0.0  ;;  %4086 = vmatpush3.bf16.msra.mxu1 %v5045_v2  ;;  %v2532_v2 = vld [vmem:[#allocation4] ss:$0 sm:$0xff] }
 0x1a1   :  { %3352 = vmatprep.mubr.f32.mxu1 %v1093_v60 }
 0x1a2   :  { %3353 = vmatmul.mubr.f32.vlgmr.msra.gmra.mrb[10].mxu1 %v1094_v58 }
 0x215   :  { %v3144_v61 = vpop.f32.mrb[4].mxu1 }
 0x216   :  { %631 = vperm.xlu0 %4420, %v3144_v61   ;;  %v612_v62 = vpop.f32.mrb[5].mxu1 }
 0x21a   :  { %626 = vperm.xlu0 %4420, %v612_v62  }
 0x235   :  { %v3214_v0 = vpop.f32.mrb[6].mxu1 }
 0x236   :  { %814 = vperm.xlu1 %4421, %v3214_v0   ;;  %v795_v1 = vpop.f32.mrb[7].mxu1 }
 0x23a   :  { %809 = vperm.xlu1 %4421, %v795_v1  }
 0x255   :  { %v3284_v4 = vpop.f32.mrb[8].mxu1 }
 0x256   :  { %997 = vperm.xlu1 %4421, %v3284_v4   ;;  %v978_v63 = vpop.f32.mrb[9].mxu1 }
 0x257   :  { %992 = vperm.xlu0 %4420, %v978_v63  }
 0x275   :  { %v3354_v5 = vpop.f32.mrb[10].mxu1 }
 0x276   :  { %1180 = vperm.xlu1 %4421, %v3354_v5   ;;  %v1161_v6 = vpop.f32.mrb[11].mxu1 }
 0x277   :  { %1175 = vperm.xlu0 %4420, %v1161_v6  }
 0x27b   :  { %1194 = vperm.xlu0 %4420, %v2532_v2  }
 0x295   :  { %v632_v8 = vpop.permute.xlu0 %631 }
 0x296   :  { %v635_v21 = vmul.f32 %v5135_v16, %v632_v8 }
 0x299   :  { %v627_v14 = vpop.permute.xlu0 %626 }
 0x29a   :  { %v634_v23 = vmul.f32 %v5135_v16, %v627_v14 }
 0x2b5   :  { %v815_v7 = vpop.permute.xlu1 %814 }
 0x2b6   :  { %v818_v19 = vmul.f32 %v5132_v3, %v815_v7 }
 0x2b8   :  { %v820_v30 = vadd.f32 %v818_v19, %v635_v21 }
 0x2b9   :  { %v810_v13 = vpop.permute.xlu1 %809 }
 0x2ba   :  { %v817_v25 = vmul.f32 %v5132_v3, %v810_v13 }
 0x2bc   :  { %v819_v31 = vadd.f32 %v817_v25, %v634_v23 }
 0x2d5   :  { %v998_v18 = vpop.permute.xlu1 %997 }
 0x2d6   :  { %v993_v20 = vpop.permute.xlu0 %992  ;;  %v1001_v22 = vmul.f32 %v5138_v17, %v998_v18 }
 0x2d7   :  { %v1000_v24 = vmul.f32 %v5138_v17, %v993_v20 }
 0x2d8   :  { %v1003_v34 = vadd.f32 %v1001_v22, %v820_v30 }
 0x2d9   :  { %v1002_v39 = vadd.f32 %v1000_v24, %v819_v31 }
 0x2f5   :  { %v1181_v33 = vpop.permute.xlu1 %1180 }
 0x2f6   :  { %v1184_v37 = vmul.f32 %v5147_v27, %v1181_v33  ;;  %v1176_v38 = vpop.permute.xlu0 %1175 }
 0x2f7   :  { %v1183_v35 = vmul.f32 %v5147_v27, %v1176_v38 }
 0x2f8   :  { %v1186_v41 = vadd.f32 %v1184_v37, %v1003_v34 }
 0x2f9   :  { %v1185_v43 = vadd.f32 %v1183_v35, %v1002_v39 }
 0x2fa   :  { %v1195_v45 = vpop.permute.xlu0 %1194 }
 0x2fb   :  { %v1197_v46 = vadd.f32 %v1195_v45, %v1185_v43  ;;  %v1198_v47 = vadd.f32 %v1195_v45, %v1186_v41 }
 0x2fd   :  { %v1199_v49 = vsub.f32 0.0, %v1197_v46  ;;  %v1200_v50 = vsub.f32 0.0, %v1198_v47 }
 0x2ff   :  { %v1201_v51 = vmul.f32 1.442695, %v1199_v49  ;;  %v1203_v12 = vmul.f32 1.442695, %v1200_v50 }
 0x301   :  { %4422 = vpow2.f32 %v1201_v51 }
 0x302   :  { %4424 = vpow2.f32 %v1203_v12 }
 0x30b   :  { %v4423_v53 = vpop.eup %4422 }
 0x30c   :  { %v4425_v55 = vpop.eup %4424  ;;  %v1205_v40 = vadd.f32 1.0, %v4423_v53 }
 0x30d   :  { %v1206_v44 = vadd.f32 1.0, %v4425_v55 }
 0x30e   :  { %4426 = vrcp.f32 %v1205_v40 }
 0x30f   :  { %4428 = vrcp.f32 %v1206_v44 }
 0x318   :  { %v4427_v48 = vpop.eup %4426 }
 0x319   :  { %v4429_v56 = vpop.eup %4428  ;;  %v1208_v59 = vmul.f32 -1.0, %v4427_v48 }
 0x31a   :  { %v1210_v54 = vmul.f32 -1.0, %v4429_v56 }
 0x31b   :  { %v1211_v57 = vmul.f32 20.0, %v1208_v59 }
 0x31c   :  { %v1212_v60 = vmul.f32 20.0, %v1210_v54 }
 0x31d   :  { %v1214_v58 = vsel %vm1213_vm5, %v1211_v57, -inf }
 0x31e   :  { %v1217_v61 = vsel %vm1213_vm5, %v1212_v60, -inf  ;;  %1215 = vmax.xlane.f32.xlu1 %v1214_v58 }
 0x31f   :  { %1218 = vmax.xlane.f32.xlu0 %v1217_v61 }
 0x3ab   :  { %v1216_v62 = vpop.xlane.xlu1 %1215 }
 0x3ac   :  { %v1219_v0 = vpop.xlane.xlu0 %1218  ;;  %v1220_v1 = vsub.f32 %v1211_v57, %v1216_v62 }
 0x3ad   :  { %v1221_v4 = vsub.f32 %v1212_v60, %v1219_v0 }
 0x3ae   :  { %v1222_v63 = vmul.f32 1.442695, %v1220_v1 }
 0x3af   :  { %v1224_v5 = vmul.f32 1.442695, %v1221_v4 }
 0x3b0   :  { %4430 = vpow2.f32 %v1222_v63 }
 0x3b1   :  { %4432 = vpow2.f32 %v1224_v5 }
 0x3ba   :  { %v4431_v6 = vpop.eup %4430 }
 0x3bb   :  { %v4433_v2 = vpop.eup %4432  ;;  %v1226_v7 = vsel %vm1213_vm5, %v4431_v6, 0.0 }
 0x3bc   :  { %v1229_v8 = vsel %vm1213_vm5, %v4433_v2, 0.0  ;;  %1227 = vadd.xlane.f32.xlu0 %v1226_v7 }
 0x3bd   :  { %1230 = vadd.xlane.f32.xlu1 %v1229_v8 }
 0x449   :  { %v1228_v13 = vpop.xlane.xlu0 %1227 }
 0x44a   :  { %4434 = vrcp.f32 %v1228_v13  ;;  %v1231_v14 = vpop.xlane.xlu1 %1230 }
 0x44b   :  { %4436 = vrcp.f32 %v1231_v14 }
 0x454   :  { %v4435_v18 = vpop.eup %4434 }
 0x455   :  { %v4437_v19 = vpop.eup %4436  ;;  %v1234_v20 = vmul.f32 %v4435_v18, %v4431_v6 }
 0x456   :  { %v1235_v25 = vmul.f32 %v4437_v19, %v4433_v2 }
 0x457   :  { %v1236_v21 = vsel %vm1213_vm5, %v1234_v20, 0.0  ;;  %1356 = vst.msk [vmem:[%s5653_s12] sm:$0xff] %vm1213_vm5, %v1234_v20 }
 0x458   :  { %1357 = vst.msk [vmem:[%s5653_s12 + $0x8] sm:$0xff] %vm1213_vm5, %v1235_v25  ;;  %v1237_v22 = vsel %vm1213_vm5, %v1235_v25, 0.0 }
 0x459   :  { %v1238_v23 = vadd.f32 %v1237_v22, %v1236_v21 }
 0x45b   :  { %v1239_v24 = vrot.slane %v1238_v23, 4 }
 0x45d   :  { %v1240_v30 = vadd.f32 %v1239_v24, %v1238_v23 }
 0x45f   :  { %v1241_v31 = vrot.slane %v1240_v30, 2 }
 0x461   :  { %v1242_v33 = vadd.f32 %v1241_v31, %v1240_v30 }
 0x463   :  { %v1243_v34 = vrot.slane %v1242_v33, 1 }
 0x465   :  { %v1244_v37 = vadd.f32 %v1243_v34, %v1242_v33 }
 0x467   :  { %v1245_v38 = vadd.f32 1e-06, %v1244_v37 }
 0x469   :  { %4438 = vrcp.f32 %v1245_v38 }
 0x473   :  { %v4439_v39 = vpop.eup %4438 }
 0x474   :  { %v1247_v35 = vmul.f32 %v4439_v39, %v1234_v20  ;;  %v1248_v41 = vmul.f32 %v4439_v39, %v1235_v25 }
 0x476   :  { %1249 = vxpose.xlu0.b32.start [1/2] (short) (narrow) %v1247_v35, 8 }
 0x47a   :  { %1250 = vxpose.xlu0.b32.end [2/2] (short) (narrow) %v1248_v41, 8 }
 0x4f6   :  { %v1265_v43 = vpop.trf.xlu0 }
 0x4f7   :  { %3360 = vmatmul.mubr.msk.f32.vlgmr.msra.gmra.mrb[10].mxu0 %vm1281_vm6, %v1265_v43 }
 0x5ca   :  { %v1351_v45 = vpop.f32.mrb[10].mxu0 }
 0x5cb   :  { %1358 = vst [vmem:[#allocation2] sm:$0xf] %v1351_v45  ;;  %v1359_v46 = vsub.f32 %v1351_v45, %v4643_v32  ;;  %v3361_v47 = vpop.f32.mrb[11].mxu0 }
 0x5cd   :  { %v1360_v49 = vand.u32 2147483647, %v1359_v46 }
 0x5cf   :  { %v1362_v50 = vsel %vm1361_vm7, %v1360_v49, 0.0 }
 0x5d0   :  { %1363 = vadd.xlane.f32.xlu1 %v1362_v50 }
 0x65d   :  { %v1364_v51 = vpop.xlane.xlu1 %1363 }
 0x65e   :  { %v1365_v12 = vrot.slane %v1364_v51, 4 }
 0x660   :  { %v1366_v53 = vadd.f32 %v1365_v12, %v1364_v51 }
 0x662   :  { %v1367_v55 = vrot.slane %v1366_v53, 2 }
 0x664   :  { %v1368_v40 = vadd.f32 %v1367_v55, %v1366_v53 }
 0x666   :  { %v1369_v44 = vrot.slane %v1368_v40, 1 }
 0x668   :  { %v1370_v48 = vadd.f32 %v1369_v44, %v1368_v40 }
 0x66a   :  { %4399 = vpush %v1370_v48 }
 0x69b   :  { %s4400_s0 = spop %4399 }
 0x69c   :  { %1373 = sst [smem:[#allocation3]] %s4400_s0 }
 0x69d LB: > { %s1380_s10 = sld [smem:[#allocation3]]  ;;  %s4490_s29 = sphi %s5173_s29, %s1379_s29  }
 0x6a3   : > { %p1381_p0 = scmp.gt.f32.partialorder %s1380_s10, 0.0001 }
 0x6a4   : > { %v1404_v32 = vld [vmem:[%s5648_s7] sm:$0xff] (%p1381_p0)  ;;  %v1405_v56 = vld [vmem:[%s5648_s7 + $0x8] sm:$0xff] (%p1381_p0)  ;;  %v4496_v54 = vmov (%p1381_p0), 0.0|0.0   ;;  %v1406_v58 = vld [vmem:[%s5648_s7 + $0x10] sm:$0xff] (%p1381_p0)  ;;  %vm4497_vm8 = vmmov (%p1381_p0), 0   ;;  %v4498_v4 = vmov (%p1381_p0), 0.0  }
 0x6a5   : > { %1384 = sbr.rel (!%p1381_p0) target bundleno = 3357 (0xd1d), region = 56  ;;  %v1386_v59 = vld [vmem:[%s5645_s4] sm:$0xff] (%p1381_p0)  ;;  %4090 = vmatprep.subr.bf16.mxu0 (%p1381_p0), %v4496_v54  ;;  %v4091_v57 = vpack.c.bf16 (%p1381_p0), %v1405_v56, %v1404_v32  ;;  %4114 = vmatprep.subr.bf16.mxu1 (%p1381_p0), %v4496_v54  ;;  %v1387_v60 = vld [vmem:[%s5645_s4 + $0x8] sm:$0xff] (%p1381_p0)  ;;  %v1407_v61 = vld [vmem:[%s5648_s7 + $0x18] sm:$0xff] (%p1381_p0) }
 0x6a6   : > { %v4115_v62 = vpack.c.bf16 (%p1381_p0), %v1387_v60, %v1386_v59  ;;  %v1388_v0 = vld [vmem:[%s5645_s4 + $0x10] sm:$0xff] (%p1381_p0)  ;;  %v1389_v1 = vld [vmem:[%s5645_s4 + $0x18] sm:$0xff] (%p1381_p0)  ;;  %3394 = vmatprep.mubr.msk.f32.mxu0 (%p1381_p0), %vm4497_vm8, %v4498_v4  ;;  %3429 = vmatprep.mubr.msk.f32.mxu1 (%p1381_p0), %vm4497_vm8, %v4498_v4  ;;  %v4094_v63 = vpack.c.bf16 (%p1381_p0), %v1407_v61, %v1406_v58  ;;  %v1408_v6 = vld [vmem:[%s5648_s7 + $0x20] sm:$0xff] (%p1381_p0) }
 0x6a7   : > { %4092 = vmatpush3.bf16.msra.mxu0 (%p1381_p0), %v4091_v57  ;;  %v4118_v5 = vpack.c.bf16 (%p1381_p0), %v1389_v1, %v1388_v0  ;;  %v1409_v2 = vld [vmem:[%s5648_s7 + $0x28] sm:$0xff] (%p1381_p0)  ;;  %v1390_v7 = vld [vmem:[%s5645_s4 + $0x20] sm:$0xff] (%p1381_p0)  ;;  %v1410_v18 = vld [vmem:[%s5648_s7 + $0x30] sm:$0xff] (%p1381_p0) }
 0x6a8   : > { %4116 = vmatpush3.bf16.msra.mxu1 (%p1381_p0), %v4115_v62  ;;  %4093 = vmatprep.subr.bf16.mxu0 (%p1381_p0), %v4496_v54  ;;  %v1391_v8 = vld [vmem:[%s5645_s4 + $0x28] sm:$0xff] (%p1381_p0)  ;;  %v4097_v13 = vpack.c.bf16 (%p1381_p0), %v1409_v2, %v1408_v6  ;;  %v1411_v19 = vld [vmem:[%s5648_s7 + $0x38] sm:$0xff] (%p1381_p0)  ;;  %v1392_v20 = vld [vmem:[%s5645_s4 + $0x30] sm:$0xff] (%p1381_p0) }
 0x6a9   : > { %4117 = vmatprep.subr.bf16.mxu1 (%p1381_p0), %v4496_v54  ;;  %v4121_v14 = vpack.c.bf16 (%p1381_p0), %v1391_v8, %v1390_v7  ;;  %v1393_v25 = vld [vmem:[%s5645_s4 + $0x38] sm:$0xff] (%p1381_p0)  ;;  %v5236_v21 = vld [vmem:[#allocation2] sm:$0xf] (%p1381_p0)  ;;  %v4100_v22 = vpack.c.bf16 (%p1381_p0), %v1411_v19, %v1410_v18  ;;  %v1413_v30 = vld [vmem:[%s5648_s7 + $0x48] sm:$0xff] (%p1381_p0) }
 0x6aa   : > { %2486 = vst [vmem:[#allocation5] sm:$0xf] (%p1381_p0), %v5236_v21  ;;  %v4124_v23 = vpack.c.bf16 (%p1381_p0), %v1393_v25, %v1392_v20  ;;  %v1412_v24 = vld [vmem:[%s5648_s7 + $0x40] sm:$0xff] (%p1381_p0)  ;;  %v1395_v33 = vld [vmem:[%s5645_s4 + $0x48] sm:$0xff] (%p1381_p0)  ;;  %v1414_v38 = vld [vmem:[%s5648_s7 + $0x50] sm:$0xff] (%p1381_p0)  ;;  %v1571_v44 = vrot.slane (%p1381_p0), %v5236_v21, %v4792_v42  ;;  %v1402_v59 = vsub.f32 (%p1381_p0), %v5236_v21, %v4636_v29 }
 0x6ab   : > { %4095 = vmatpush3.bf16.msra.mxu0 (%p1381_p0), %v4094_v63  ;;  %v1394_v31 = vld [vmem:[%s5645_s4 + $0x40] sm:$0xff] (%p1381_p0)  ;;  %v4103_v34 = vpack.c.bf16 (%p1381_p0), %v1413_v30, %v1412_v24  ;;  %v1415_v39 = vld [vmem:[%s5648_s7 + $0x58] sm:$0xff] (%p1381_p0)  ;;  %v1396_v35 = vld [vmem:[%s5645_s4 + $0x50] sm:$0xff] (%p1381_p0) }
 0x6ac   : > { %4119 = vmatpush3.bf16.msra.mxu1 %v4118_v5  ;;  %4096 = vmatprep.subr.bf16.mxu0 %v4496_v54  ;;  %v4127_v37 = vpack.c.bf16 %v1395_v33, %v1394_v31  ;;  %v1397_v41 = vld [vmem:[%s5645_s4 + $0x58] sm:$0xff]  ;;  %v4106_v43 = vpack.c.bf16 %v1415_v39, %v1414_v38  ;;  %v1416_v46 = vld [vmem:[%s5648_s7 + $0x60] sm:$0xff]  ;;  %v1417_v47 = vld [vmem:[%s5648_s7 + $0x68] sm:$0xff]  ;;  %v1572_v61 = vsub.f32 %v4631_v28, %v1571_v44  ;;  %v1403_v1 = vand.u32 2147483647, %v1402_v59 }
 0x6ad   : > { %4120 = vmatprep.subr.bf16.mxu1 %v4496_v54  ;;  %v4130_v45 = vpack.c.bf16 %v1397_v41, %v1396_v35  ;;  %v1398_v49 = vld [vmem:[%s5645_s4 + $0x60] sm:$0xff]  ;;  %v1399_v50 = vld [vmem:[%s5645_s4 + $0x68] sm:$0xff]  ;;  %v4109_v51 = vpack.c.bf16 %v1417_v47, %v1416_v46  ;;  %v1418_v53 = vld [vmem:[%s5648_s7 + $0x70] sm:$0xff]  ;;  %v1573_v39 = vsub.f32 %v4688_v52, %v1571_v44 }
 0x6ae   : > { %v4133_v12 = vpack.c.bf16 %v1399_v50, %v1398_v49  ;;  %v1419_v55 = vld [vmem:[%s5648_s7 + $0x78] sm:$0xff]  ;;  %v1400_v40 = vld [vmem:[%s5645_s4 + $0x70] sm:$0xff]  ;;  %v1576_v32 = vld [vmem:[%s5646_s5] sm:$0xff]  ;;  %v1574_v5 = vand.u32 2147483647, %v1572_v61 }
 0x6af   : > { %4098 = vmatpush3.bf16.msra.mxu0 %v4097_v13  ;;  %v1401_v48 = vld [vmem:[%s5645_s4 + $0x78] sm:$0xff]  ;;  %v1577_v56 = vld [vmem:[%s5646_s5 + $0x8] sm:$0xff]  ;;  %v4112_v57 = vpack.c.bf16 %v1419_v55, %v1418_v53  ;;  %v1578_v62 = vld [vmem:[%s5646_s5 + $0x10] sm:$0xff]  ;;  %v1575_v41 = vand.u32 2147483647, %v1573_v39 }
 0x6b0   : > { %4122 = vmatpush3.bf16.msra.mxu1 %v4121_v14  ;;  %4099 = vmatprep.subr.bf16.mxu0 %v4496_v54  ;;  %v4136_v60 = vpack.c.bf16 %v1401_v48, %v1400_v40  ;;  %v5306_v58 = vpack.c.bf16 %v1577_v56, %v1576_v32  ;;  %v1579_v0 = vld [vmem:[%s5646_s5 + $0x18] sm:$0xff]  ;;  %v1580_v6 = vld [vmem:[%s5646_s5 + $0x20] sm:$0xff]  ;;  %v1581_v2 = vld [vmem:[%s5646_s5 + $0x28] sm:$0xff] }
 0x6b1   : > { %4123 = vmatprep.subr.bf16.mxu1 %v4496_v54  ;;  %v5317_v63 = vpack.c.bf16 %v1579_v0, %v1578_v62  ;;  %v5328_v7 = vpack.c.bf16 %v1581_v2, %v1580_v6  ;;  %v1582_v8 = vld [vmem:[%s5646_s5 + $0x30] sm:$0xff]  ;;  %v1583_v13 = vld [vmem:[%s5646_s5 + $0x38] sm:$0xff]  ;;  %v1584_v18 = vld [vmem:[%s5646_s5 + $0x40] sm:$0xff] }
 0x6b2   : > { %v5338_v14 = vpack.c.bf16 %v1583_v13, %v1582_v8  ;;  %v1585_v19 = vld [vmem:[%s5646_s5 + $0x48] sm:$0xff]  ;;  %v1586_v25 = vld [vmem:[%s5646_s5 + $0x50] sm:$0xff]  ;;  %v1588_v24 = vld [vmem:[%s5646_s5 + $0x60] sm:$0xff] }
 0x6b3   : > { %4101 = vmatpush3.bf16.msra.mxu0 %v4100_v22  ;;  %v5348_v20 = vpack.c.bf16 %v1585_v19, %v1584_v18  ;;  %v1587_v22 = vld [vmem:[%s5646_s5 + $0x58] sm:$0xff]  ;;  %v1589_v30 = vld [vmem:[%s5646_s5 + $0x68] sm:$0xff]  ;;  %v1590_v33 = vld [vmem:[%s5646_s5 + $0x70] sm:$0xff] }
 0x6b4   : > { %4125 = vmatpush3.bf16.msra.mxu1 %v4124_v23  ;;  %4102 = vmatprep.subr.bf16.mxu0 %v4496_v54  ;;  %v5358_v23 = vpack.c.bf16 %v1587_v22, %v1586_v25  ;;  %v5368_v31 = vpack.c.bf16 %v1589_v30, %v1588_v24  ;;  %v1676_v53 = vld [vmem:[%s5650_s9 + $0x8] sm:$0xff]  ;;  %v1677_v55 = vld [vmem:[%s5650_s9 + $0x10] sm:$0xff]  ;;  %v1678_v48 = vld [vmem:[%s5650_s9 + $0x18] sm:$0xff] }
 0x6b5   : > { %4126 = vmatprep.subr.bf16.mxu1 %v4496_v54  ;;  %v5442_v56 = vpack.c.bf16 %v1678_v48, %v1677_v55  ;;  %v1679_v59 = vld [vmem:[%s5650_s9 + $0x20] sm:$0xff]  ;;  %v1681_v0 = vld [vmem:[%s5650_s9 + $0x30] sm:$0xff]  ;;  %v1684_v2 = vld [vmem:[%s5650_s9 + $0x48] sm:$0xff] }
 0x6b6   : > { %v1683_v6 = vld [vmem:[%s5650_s9 + $0x40] sm:$0xff]  ;;  %v1686_v13 = vld [vmem:[%s5650_s9 + $0x58] sm:$0xff] }
 0x6b7   : > { %4104 = vmatpush3.bf16.msra.mxu0 %v4103_v34  ;;  %v1591_v34 = vld [vmem:[%s5646_s5 + $0x78] sm:$0xff]  ;;  %v5478_v8 = vpack.c.bf16 %v1684_v2, %v1683_v6 }
 0x6b8   : > { %4128 = vmatpush3.bf16.msra.mxu1 %v4127_v37  ;;  %4105 = vmatprep.subr.bf16.mxu0 %v4496_v54  ;;  %v1783_v37 = vrot.slane %v5236_v21, %v4885_v15  ;;  %v5380_v38 = vpack.c.bf16 %v1591_v34, %v1590_v33 }
 0x6b9   : > { %4129 = vmatprep.subr.bf16.mxu1 %v4496_v54 }
 0x6ba   : > { %v1784_v35 = vsub.f32 %v4631_v28, %v1783_v37  ;;  %v1785_v46 = vsub.f32 %v4688_v52, %v1783_v37  ;;  %v4499_v37 = vmov 0  }
 0x6bb   : > { %4107 = vmatpush3.bf16.msra.mxu0 %v4106_v43  ;;  %4440 = vset.pattern.permute.xlu0 %v4499_v37 }
 0x6bc   : > { %4131 = vmatpush3.bf16.msra.mxu1 %v4130_v45  ;;  %4108 = vmatprep.subr.bf16.mxu0 %v4496_v54  ;;  %v1786_v43 = vand.u32 2147483647, %v1784_v35  ;;  %v1963_v45 = vrot.slane %v5236_v21, %v4918_v26  ;;  %v1787_v49 = vand.u32 2147483647, %v1785_v46 }
 0x6bd   : > { %4132 = vmatprep.subr.bf16.mxu1 %v4496_v54  ;;  %4441 = vset.pattern.permute.xlu1 %v4499_v37 }
 0x6be   : > { %v1964_v47 = vsub.f32 %v4631_v28, %v1963_v45  ;;  %v1965_v40 = vsub.f32 %v4688_v52, %v1963_v45 }
 0x6bf   : > { %4110 = vmatpush3.bf16.msra.mxu0 %v4109_v51  ;;  %v5421_v51 = vrot.slane %v5236_v21, %v4941_v36 }
 0x6c0   : > { %4134 = vmatpush3.bf16.msra.mxu1 %v4133_v12  ;;  %4111 = vmatprep.subr.bf16.mxu0 %v4496_v54  ;;  %v1966_v50 = vand.u32 2147483647, %v1964_v47  ;;  %v1675_v12 = vld [vmem:[%s5650_s9] sm:$0xff] }
 0x6c1   : > { %4135 = vmatprep.subr.bf16.mxu1 %v4496_v54  ;;  %v5434_v44 = vpack.c.bf16 %v1676_v53, %v1675_v12  ;;  %v2144_v32 = vsub.f32 %v4631_v28, %v5421_v51  ;;  %v2145_v22 = vsub.f32 %v4688_v52, %v5421_v51 }
 0x6c3   : > { %4113 = vmatpush3.bf16.msra.mxu0 %v4112_v57  ;;  %v1680_v57 = vld [vmem:[%s5650_s9 + $0x28] sm:$0xff]  ;;  %v2146_v62 = vand.u32 2147483647, %v2144_v32 }
 0x6c4   : > { %4137 = vmatpush3.bf16.msra.mxu1 %v4136_v60  ;;  %4139 = vmatprep.subr.bf16.mxu0 %v5306_v58  ;;  %v1967_v60 = vand.u32 2147483647, %v1965_v40  ;;  %v5454_v61 = vpack.c.bf16 %v1680_v57, %v1679_v59 }
 0x6c5   : > { %4171 = vmatprep.subr.bf16.mxu1 %v5434_v44 }
 0x6c6   : > { %3395 = vmatmul.mubr.f32.vlgmr.msra.gmra.mrb[0].mxu0 %v1403_v1  ;;  %v1682_v1 = vld [vmem:[%s5650_s9 + $0x38] sm:$0xff] }
 0x6c7   : > { %3430 = vmatmul.mubr.f32.vlgmr.msra.gmra.mrb[0].mxu1 %v5236_v21  ;;  %4141 = vmatpush3.bf16.msra.mxu0 %v5306_v58 }
 0x6c8   : > { %4143 = vmatprep.subr.bf16.mxu0 %v5317_v63  ;;  %3464 = vmatprep.mubr.f32.mxu0 %v1574_v5  ;;  %v5466_v5 = vpack.c.bf16 %v1682_v1, %v1681_v0 }
 0x6c9   : > { %4173 = vmatpush3.bf16.msra.mxu1 %v5434_v44 }
 0x6ca   : > { %4175 = vmatprep.subr.bf16.mxu1 %v5442_v56 }
 0x6cb   : > { %4145 = vmatpush3.bf16.msra.mxu0 %v5317_v63 }
 0x6cc   : > { %4147 = vmatprep.subr.bf16.mxu0 %v5328_v7 }
 0x6cd   : > { %4177 = vmatpush3.bf16.msra.mxu1 %v5442_v56 }
 0x6ce   : > { %4179 = vmatprep.subr.bf16.mxu1 %v5454_v61 }
 0x6cf   : > { %4149 = vmatpush3.bf16.msra.mxu0 %v5328_v7 }
 0x6d0   : > { %4151 = vmatprep.subr.bf16.mxu0 %v5338_v14 }
 0x6d1   : > { %4181 = vmatpush3.bf16.msra.mxu1 %v5454_v61 }
 0x6d2   : > { %4183 = vmatprep.subr.bf16.mxu1 %v5466_v5 }
 0x6d3   : > { %4153 = vmatpush3.bf16.msra.mxu0 %v5338_v14 }
 0x6d4   : > { %4155 = vmatprep.subr.bf16.mxu0 %v5348_v20 }
 0x6d5   : > { %4185 = vmatpush3.bf16.msra.mxu1 %v5466_v5 }
 0x6d6   : > { %4187 = vmatprep.subr.bf16.mxu1 %v5478_v8 }
 0x6d7   : > { %4157 = vmatpush3.bf16.msra.mxu0 %v5348_v20 }
 0x6d8   : > { %4159 = vmatprep.subr.bf16.mxu0 %v5358_v23 }
 0x6d9   : > { %4189 = vmatpush3.bf16.msra.mxu1 %v5478_v8 }
 0x6db   : > { %4161 = vmatpush3.bf16.msra.mxu0 %v5358_v23 }
 0x6dc   : > { %4163 = vmatprep.subr.bf16.mxu0 %v5368_v31 }
 0x6df   : > { %4165 = vmatpush3.bf16.msra.mxu0 %v5368_v31 }
 0x6e0   : > { %4167 = vmatprep.subr.bf16.mxu0 %v5380_v38 }
 0x6e3   : > { %4169 = vmatpush3.bf16.msra.mxu0 %v5380_v38 }
 0x6e4   : > { %4203 = vmatprep.subr.bf16.mxu0 %v5306_v58 }
 0x6e6   : > { %3465 = vmatmul.mubr.f32.vlgmr.msra.gmra.mrb[2].mxu0 %v1575_v41 }
 0x6e7   : > { %4205 = vmatpush3.bf16.msra.mxu0 %v5306_v58  ;;  %3534 = vmatprep.mubr.f32.mxu0 %v1786_v43 }
 0x6e8   : > { %4207 = vmatprep.subr.bf16.mxu0 %v5317_v63 }
 0x6eb   : > { %4209 = vmatpush3.bf16.msra.mxu0 %v5317_v63 }
 0x6ec   : > { %4211 = vmatprep.subr.bf16.mxu0 %v5328_v7 }
 0x6ef   : > { %4213 = vmatpush3.bf16.msra.mxu0 %v5328_v7 }
 0x6f0   : > { %4215 = vmatprep.subr.bf16.mxu0 %v5338_v14 }
 0x6f3   : > { %4217 = vmatpush3.bf16.msra.mxu0 %v5338_v14 }
 0x6f4   : > { %4219 = vmatprep.subr.bf16.mxu0 %v5348_v20 }
 0x6f7   : > { %4221 = vmatpush3.bf16.msra.mxu0 %v5348_v20 }
 0x6f8   : > { %4223 = vmatprep.subr.bf16.mxu0 %v5358_v23 }
 0x6fb   : > { %4225 = vmatpush3.bf16.msra.mxu0 %v5358_v23 }
 0x6fc   : > { %4227 = vmatprep.subr.bf16.mxu0 %v5368_v31 }
 0x6ff   : > { %4229 = vmatpush3.bf16.msra.mxu0 %v5368_v31 }
 0x700   : > { %4231 = vmatprep.subr.bf16.mxu0 %v5380_v38 }
 0x703   : > { %4233 = vmatpush3.bf16.msra.mxu0 %v5380_v38 }
 0x704   : > { %4267 = vmatprep.subr.bf16.mxu0 %v5306_v58 }
 0x706   : > { %3535 = vmatmul.mubr.f32.vlgmr.msra.gmra.mrb[4].mxu0 %v1787_v49 }
 0x707   : > { %4269 = vmatpush3.bf16.msra.mxu0 %v5306_v58  ;;  %3604 = vmatprep.mubr.f32.mxu0 %v1966_v50 }
 0x708   : > { %4271 = vmatprep.subr.bf16.mxu0 %v5317_v63 }
 0x70b   : > { %4273 = vmatpush3.bf16.msra.mxu0 %v5317_v63 }
 0x70c   : > { %4275 = vmatprep.subr.bf16.mxu0 %v5328_v7 }
 0x70f   : > { %4277 = vmatpush3.bf16.msra.mxu0 %v5328_v7 }
 0x710   : > { %4279 = vmatprep.subr.bf16.mxu0 %v5338_v14 }
 0x713   : > { %4281 = vmatpush3.bf16.msra.mxu0 %v5338_v14 }
 0x714   : > { %4283 = vmatprep.subr.bf16.mxu0 %v5348_v20 }
 0x717   : > { %4285 = vmatpush3.bf16.msra.mxu0 %v5348_v20 }
 0x718   : > { %4287 = vmatprep.subr.bf16.mxu0 %v5358_v23 }
 0x71b   : > { %4289 = vmatpush3.bf16.msra.mxu0 %v5358_v23 }
 0x71c   : > { %4291 = vmatprep.subr.bf16.mxu0 %v5368_v31 }
 0x71f   : > { %4293 = vmatpush3.bf16.msra.mxu0 %v5368_v31 }
 0x720   : > { %4295 = vmatprep.subr.bf16.mxu0 %v5380_v38 }
 0x723   : > { %4297 = vmatpush3.bf16.msra.mxu0 %v5380_v38 }
 0x724   : > { %4331 = vmatprep.subr.bf16.mxu0 %v5306_v58 }
 0x726   : > { %3605 = vmatmul.mubr.f32.vlgmr.msra.gmra.mrb[6].mxu0 %v1967_v60 }
 0x727   : > { %4333 = vmatpush3.bf16.msra.mxu0 %v5306_v58  ;;  %3674 = vmatprep.mubr.f32.mxu0 %v2146_v62  ;;  %v1685_v58 = vld [vmem:[%s5650_s9 + $0x50] sm:$0xff] }
 0x728   : > { %4335 = vmatprep.subr.bf16.mxu0 %v5317_v63  ;;  %v5490_v18 = vpack.c.bf16 %v1686_v13, %v1685_v58 }
 0x72a   : > { %4191 = vmatprep.subr.bf16.mxu1 %v5490_v18 }
 0x72b   : > { %4337 = vmatpush3.bf16.msra.mxu0 %v5317_v63  ;;  %4193 = vmatpush3.bf16.msra.mxu1 %v5490_v18  ;;  %v1687_v63 = vld [vmem:[%s5650_s9 + $0x60] sm:$0xff] }
 0x72c   : > { %4339 = vmatprep.subr.bf16.mxu0 %v5328_v7 }
 0x72f   : > { %4341 = vmatpush3.bf16.msra.mxu0 %v5328_v7  ;;  %v1688_v7 = vld [vmem:[%s5650_s9 + $0x68] sm:$0xff] }
 0x730   : > { %4343 = vmatprep.subr.bf16.mxu0 %v5338_v14  ;;  %v5507_v19 = vpack.c.bf16 %v1688_v7, %v1687_v63 }
 0x732   : > { %4195 = vmatprep.subr.bf16.mxu1 %v5507_v19 }
 0x733   : > { %4345 = vmatpush3.bf16.msra.mxu0 %v5338_v14  ;;  %4197 = vmatpush3.bf16.msra.mxu1 %v5507_v19  ;;  %v1689_v14 = vld [vmem:[%s5650_s9 + $0x70] sm:$0xff] }
 0x734   : > { %4347 = vmatprep.subr.bf16.mxu0 %v5348_v20 }
 0x737   : > { %4349 = vmatpush3.bf16.msra.mxu0 %v5348_v20  ;;  %v1690_v20 = vld [vmem:[%s5650_s9 + $0x78] sm:$0xff] }
 0x738   : > { %4351 = vmatprep.subr.bf16.mxu0 %v5358_v23  ;;  %v5519_v25 = vpack.c.bf16 %v1690_v20, %v1689_v14 }
 0x73a   : > { %4199 = vmatprep.subr.bf16.mxu1 %v5519_v25 }
 0x73b   : > { %4353 = vmatpush3.bf16.msra.mxu0 %v5358_v23  ;;  %4201 = vmatpush3.bf16.msra.mxu1 %v5519_v25  ;;  %v2147_v23 = vand.u32 2147483647, %v2145_v22 }
 0x73c   : > { %4355 = vmatprep.subr.bf16.mxu0 %v5368_v31  ;;  %4235 = vmatprep.subr.bf16.mxu1 %v5434_v44 }
 0x73f   : > { %4357 = vmatpush3.bf16.msra.mxu0 %v5368_v31 }
 0x740   : > { %4359 = vmatprep.subr.bf16.mxu0 %v5380_v38 }
 0x743   : > { %4361 = vmatpush3.bf16.msra.mxu0 %v5380_v38  ;;  %v2534_v38 = vld [vmem:[%s5649_s8] ss:$0 sm:$0xff] }
 0x744   : > { %4394 = vmatprep.subr.bf16.mxu0 %v4496_v54 }
 0x746   : > { %3675 = vmatmul.mubr.f32.vlgmr.msra.gmra.mrb[8].mxu0 %v2147_v23 }
 0x747   : > { %4396 = vmatpush3.bf16.msra.mxu0 %v5157_v10  ;;  %3716 = vmatprep.mubr.msk.f32.mxu0 %vm4497_vm8, %v4498_v4 }
 0x799   : > { %v1486_v24 = vpop.f32.mrb[0].mxu0 }
 0x79a   : > { %v3396_v30 = vpop.f32.mrb[1].mxu0  ;;  %v1556_v31 = vpop.f32.mrb[0].mxu1 }
 0x79b   : > { %v1557_v33 = vadd.f32 %v1556_v31, %v1486_v24  ;;  %v3431_v34 = vpop.f32.mrb[1].mxu1 }
 0x79d   : > { %v5536_v39 = vadd.f32 %v2534_v38, %v1557_v33 }
 0x79f   : > { %v1670_v4 = vrot.slane %v5536_v39, %v4792_v42  ;;  %v1866_v12 = vrot.slane %v5536_v39, %v4885_v15  ;;  %v2046_v62 = vrot.slane %v5536_v39, %v4918_v26 }
 0x7b9   : > { %v3466_v54 = vpop.f32.mrb[2].mxu0 }
 0x7ba   : > { %v1664_v35 = vadd.f32 %v3466_v54, %v5058_v9  ;;  %v1658_v41 = vpop.f32.mrb[3].mxu0 }
 0x7bb   : > { %v1659_v43 = vadd.f32 %v1658_v41, %v5060_v11 }
 0x7bc   : > { %v1672_v45 = vadd.f32 %v1670_v4, %v1664_v35 }
 0x7bd   : > { %v1671_v46 = vadd.f32 %v1670_v4, %v1659_v43 }
 0x7be   : > { %v1674_v49 = vmax.f32 %v1672_v45, 0.0 }
 0x7bf   : > { %v1673_v47 = vmax.f32 %v1671_v46, 0.0 }
 0x7c1   : > { %3499 = vmatprep.mubr.f32.mxu1 %v1673_v47 }
 0x7c2   : > { %3500 = vmatmul.mubr.f32.vlgmr.msra.gmra.mrb[2].mxu1 %v1674_v49 }
 0x7c3   : > { %4237 = vmatpush3.bf16.msra.mxu1 %v5434_v44 }
 0x7c4   : > { %4239 = vmatprep.subr.bf16.mxu1 %v5442_v56 }
 0x7c7   : > { %4241 = vmatpush3.bf16.msra.mxu1 %v5442_v56 }
 0x7c8   : > { %4243 = vmatprep.subr.bf16.mxu1 %v5454_v61 }
 0x7cb   : > { %4245 = vmatpush3.bf16.msra.mxu1 %v5454_v61 }
 0x7cc   : > { %4247 = vmatprep.subr.bf16.mxu1 %v5466_v5 }
 0x7cf   : > { %4249 = vmatpush3.bf16.msra.mxu1 %v5466_v5 }
 0x7d0   : > { %4251 = vmatprep.subr.bf16.mxu1 %v5478_v8 }
 0x7d3   : > { %4253 = vmatpush3.bf16.msra.mxu1 %v5478_v8 }
 0x7d4   : > { %4255 = vmatprep.subr.bf16.mxu1 %v5490_v18 }
 0x7d7   : > { %4257 = vmatpush3.bf16.msra.mxu1 %v5490_v18 }
 0x7d8   : > { %4259 = vmatprep.subr.bf16.mxu1 %v5507_v19 }
 0x7d9   : > { %v3536_v50 = vpop.f32.mrb[4].mxu0 }
 0x7da   : > { %v1860_v51 = vadd.f32 %v3536_v50, %v5058_v9  ;;  %v1854_v53 = vpop.f32.mrb[5].mxu0 }
 0x7db   : > { %v1855_v55 = vadd.f32 %v1854_v53, %v5060_v11  ;;  %4261 = vmatpush3.bf16.msra.mxu1 %v5507_v19 }
 0x7dc   : > { %v1868_v40 = vadd.f32 %v1866_v12, %v1860_v51  ;;  %4263 = vmatprep.subr.bf16.mxu1 %v5519_v25 }
 0x7dd   : > { %v1867_v48 = vadd.f32 %v1866_v12, %v1855_v55 }
 0x7de   : > { %v1870_v59 = vmax.f32 %v1868_v40, 0.0 }
 0x7df   : > { %v1869_v32 = vmax.f32 %v1867_v48, 0.0  ;;  %4265 = vmatpush3.bf16.msra.mxu1 %v5519_v25 }
 0x7e0   : > { %4299 = vmatprep.subr.bf16.mxu1 %v5434_v44 }
 0x7e1   : > { %3569 = vmatprep.mubr.f32.mxu1 %v1869_v32 }
 0x7e2   : > { %3570 = vmatmul.mubr.f32.vlgmr.msra.gmra.mrb[4].mxu1 %v1870_v59 }
 0x7e3   : > { %4301 = vmatpush3.bf16.msra.mxu1 %v5434_v44 }
 0x7e4   : > { %4303 = vmatprep.subr.bf16.mxu1 %v5442_v56 }
 0x7e7   : > { %4305 = vmatpush3.bf16.msra.mxu1 %v5442_v56 }
 0x7e8   : > { %4307 = vmatprep.subr.bf16.mxu1 %v5454_v61 }
 0x7eb   : > { %4309 = vmatpush3.bf16.msra.mxu1 %v5454_v61 }
 0x7ec   : > { %4311 = vmatprep.subr.bf16.mxu1 %v5466_v5 }
 0x7ef   : > { %4313 = vmatpush3.bf16.msra.mxu1 %v5466_v5 }
 0x7f0   : > { %4315 = vmatprep.subr.bf16.mxu1 %v5478_v8 }
 0x7f3   : > { %4317 = vmatpush3.bf16.msra.mxu1 %v5478_v8 }
 0x7f4   : > { %4319 = vmatprep.subr.bf16.mxu1 %v5490_v18 }
 0x7f7   : > { %4321 = vmatpush3.bf16.msra.mxu1 %v5490_v18 }
 0x7f8   : > { %4323 = vmatprep.subr.bf16.mxu1 %v5507_v19 }
 0x7f9   : > { %v3606_v57 = vpop.f32.mrb[6].mxu0 }
 0x7fa   : > { %v2040_v60 = vadd.f32 %v3606_v57, %v5058_v9  ;;  %v2034_v0 = vpop.f32.mrb[7].mxu0 }
 0x7fb   : > { %v2035_v1 = vadd.f32 %v2034_v0, %v5060_v11  ;;  %4325 = vmatpush3.bf16.msra.mxu1 %v5507_v19 }
 0x7fc   : > { %v2048_v6 = vadd.f32 %v2046_v62, %v2040_v60  ;;  %4327 = vmatprep.subr.bf16.mxu1 %v5519_v25 }
 0x7fd   : > { %v2047_v2 = vadd.f32 %v2046_v62, %v2035_v1 }
 0x7fe   : > { %v2050_v13 = vmax.f32 %v2048_v6, 0.0 }
 0x7ff   : > { %v2049_v58 = vmax.f32 %v2047_v2, 0.0  ;;  %4329 = vmatpush3.bf16.msra.mxu1 %v5519_v25 }
 0x800   : > { %4363 = vmatprep.subr.bf16.mxu1 %v5434_v44 }
 0x801   : > { %3639 = vmatprep.mubr.f32.mxu1 %v2049_v58 }
 0x802   : > { %3640 = vmatmul.mubr.f32.vlgmr.msra.gmra.mrb[6].mxu1 %v2050_v13 }
 0x803   : > { %4365 = vmatpush3.bf16.msra.mxu1 %v5434_v44 }
 0x804   : > { %4367 = vmatprep.subr.bf16.mxu1 %v5442_v56 }
 0x807   : > { %4369 = vmatpush3.bf16.msra.mxu1 %v5442_v56 }
 0x808   : > { %4371 = vmatprep.subr.bf16.mxu1 %v5454_v61 }
 0x80b   : > { %4373 = vmatpush3.bf16.msra.mxu1 %v5454_v61  ;;  %v2226_v61 = vrot.slane %v5536_v39, %v4941_v36 }
 0x80c   : > { %4375 = vmatprep.subr.bf16.mxu1 %v5466_v5 }
 0x80f   : > { %4377 = vmatpush3.bf16.msra.mxu1 %v5466_v5 }
 0x810   : > { %4379 = vmatprep.subr.bf16.mxu1 %v5478_v8 }
 0x813   : > { %4381 = vmatpush3.bf16.msra.mxu1 %v5478_v8 }
 0x814   : > { %4383 = vmatprep.subr.bf16.mxu1 %v5490_v18 }
 0x817   : > { %4385 = vmatpush3.bf16.msra.mxu1 %v5490_v18 }
 0x818   : > { %4387 = vmatprep.subr.bf16.mxu1 %v5507_v19 }
 0x819   : > { %v3676_v44 = vpop.f32.mrb[8].mxu0 }
 0x81a   : > { %v2220_v56 = vadd.f32 %v3676_v44, %v5058_v9  ;;  %v2214_v63 = vpop.f32.mrb[9].mxu0 }
 0x81b   : > { %v2215_v7 = vadd.f32 %v2214_v63, %v5060_v11  ;;  %4389 = vmatpush3.bf16.msra.mxu1 %v5507_v19 }
 0x81c   : > { %v2228_v5 = vadd.f32 %v2226_v61, %v2220_v56  ;;  %4391 = vmatprep.subr.bf16.mxu1 %v5519_v25 }
 0x81d   : > { %v2227_v8 = vadd.f32 %v2226_v61, %v2215_v7 }
 0x81e   : > { %v2230_v18 = vmax.f32 %v2228_v5, 0.0 }
 0x81f   : > { %v2229_v14 = vmax.f32 %v2227_v8, 0.0  ;;  %4393 = vmatpush3.bf16.msra.mxu1 %v5519_v25  ;;  %v2535_v25 = vld [vmem:[#allocation4] ss:$0 sm:$0xff] }
 0x821   : > { %3709 = vmatprep.mubr.f32.mxu1 %v2229_v14 }
 0x822   : > { %3710 = vmatmul.mubr.f32.vlgmr.msra.gmra.mrb[8].mxu1 %v2230_v18 }
 0x895   : > { %v3501_v20 = vpop.f32.mrb[2].mxu1 }
 0x896   : > { %1773 = vperm.xlu0 %4440, %v3501_v20   ;;  %v1757_v22 = vpop.f32.mrb[3].mxu1 }
 0x89a   : > { %1768 = vperm.xlu0 %4440, %v1757_v22  }
 0x8b5   : > { %v3571_v23 = vpop.f32.mrb[4].mxu1 }
 0x8b6   : > { %1953 = vperm.xlu1 %4441, %v3571_v23   ;;  %v1937_v24 = vpop.f32.mrb[5].mxu1 }
 0x8ba   : > { %1948 = vperm.xlu1 %4441, %v1937_v24  }
 0x8d5   : > { %v3641_v30 = vpop.f32.mrb[6].mxu1 }
 0x8d6   : > { %2133 = vperm.xlu1 %4441, %v3641_v30   ;;  %v2117_v19 = vpop.f32.mrb[7].mxu1 }
 0x8d7   : > { %2128 = vperm.xlu0 %4440, %v2117_v19  }
 0x8f5   : > { %v3711_v31 = vpop.f32.mrb[8].mxu1 }
 0x8f6   : > { %2313 = vperm.xlu1 %4441, %v3711_v31   ;;  %v2297_v33 = vpop.f32.mrb[9].mxu1 }
 0x8f7   : > { %2308 = vperm.xlu0 %4440, %v2297_v33  }
 0x8fb   : > { %2327 = vperm.xlu0 %4440, %v2535_v25  }
 0x915   : > { %v1774_v37 = vpop.permute.xlu0 %1773 }
 0x916   : > { %v1777_v43 = vmul.f32 %v5135_v16, %v1774_v37 }
 0x919   : > { %v1769_v39 = vpop.permute.xlu0 %1768 }
 0x91a   : > { %v1776_v46 = vmul.f32 %v5135_v16, %v1769_v39 }
 0x935   : > { %v1954_v34 = vpop.permute.xlu1 %1953 }
 0x936   : > { %v1957_v35 = vmul.f32 %v5132_v3, %v1954_v34 }
 0x938   : > { %v1959_v49 = vadd.f32 %v1957_v35, %v1777_v43 }
 0x939   : > { %v1949_v38 = vpop.permute.xlu1 %1948 }
 0x93a   : > { %v1956_v41 = vmul.f32 %v5132_v3, %v1949_v38 }
 0x93c   : > { %v1958_v50 = vadd.f32 %v1956_v41, %v1776_v46 }
 0x955   : > { %v2134_v54 = vpop.permute.xlu1 %2133 }
 0x956   : > { %v2129_v4 = vpop.permute.xlu0 %2128  ;;  %v2137_v45 = vmul.f32 %v5138_v17, %v2134_v54 }
 0x957   : > { %v2136_v47 = vmul.f32 %v5138_v17, %v2129_v4 }
 0x958   : > { %v2139_v12 = vadd.f32 %v2137_v45, %v1959_v49 }
 0x959   : > { %v2138_v40 = vadd.f32 %v2136_v47, %v1958_v50 }
 0x975   : > { %v2314_v51 = vpop.permute.xlu1 %2313 }
 0x976   : > { %v2317_v53 = vmul.f32 %v5147_v27, %v2314_v51  ;;  %v2309_v55 = vpop.permute.xlu0 %2308 }
 0x977   : > { %v2316_v48 = vmul.f32 %v5147_v27, %v2309_v55 }
 0x978   : > { %v2319_v32 = vadd.f32 %v2317_v53, %v2139_v12 }
 0x979   : > { %v2318_v59 = vadd.f32 %v2316_v48, %v2138_v40 }
 0x97a   : > { %v2328_v57 = vpop.permute.xlu0 %2327 }
 0x97b   : > { %v2330_v60 = vadd.f32 %v2328_v57, %v2318_v59  ;;  %v2331_v62 = vadd.f32 %v2328_v57, %v2319_v32 }
 0x97d   : > { %v2332_v0 = vsub.f32 0.0, %v2330_v60  ;;  %v2333_v1 = vsub.f32 0.0, %v2331_v62 }
 0x97f   : > { %v2334_v6 = vmul.f32 1.442695, %v2332_v0  ;;  %v2336_v2 = vmul.f32 1.442695, %v2333_v1 }
 0x981   : > { %4442 = vpow2.f32 %v2334_v6 }
 0x982   : > { %4444 = vpow2.f32 %v2336_v2 }
 0x98b   : > { %v4443_v58 = vpop.eup %4442 }
 0x98c   : > { %v4445_v13 = vpop.eup %4444  ;;  %v2338_v44 = vadd.f32 1.0, %v4443_v58 }
 0x98d   : > { %v2339_v56 = vadd.f32 1.0, %v4445_v13 }
 0x98e   : > { %4446 = vrcp.f32 %v2338_v44 }
 0x98f   : > { %4448 = vrcp.f32 %v2339_v56 }
 0x998   : > { %v4447_v61 = vpop.eup %4446 }
 0x999   : > { %v4449_v63 = vpop.eup %4448  ;;  %v2341_v7 = vmul.f32 -1.0, %v4447_v61 }
 0x99a   : > { %v2343_v5 = vmul.f32 -1.0, %v4449_v63 }
 0x99b   : > { %v2344_v8 = vmul.f32 20.0, %v2341_v7 }
 0x99c   : > { %v2345_v14 = vmul.f32 20.0, %v2343_v5 }
 0x99d   : > { %v2346_v18 = vsel %vm1213_vm5, %v2344_v8, -inf }
 0x99e   : > { %v2349_v20 = vsel %vm1213_vm5, %v2345_v14, -inf  ;;  %2347 = vmax.xlane.f32.xlu1 %v2346_v18 }
 0x99f   : > { %2350 = vmax.xlane.f32.xlu0 %v2349_v20 }
 0xa2b   : > { %v2348_v22 = vpop.xlane.xlu1 %2347 }
 0xa2c   : > { %v2351_v23 = vpop.xlane.xlu0 %2350  ;;  %v2352_v24 = vsub.f32 %v2344_v8, %v2348_v22 }
 0xa2d   : > { %v2353_v30 = vsub.f32 %v2345_v14, %v2351_v23 }
 0xa2e   : > { %v2354_v19 = vmul.f32 1.442695, %v2352_v24 }
 0xa2f   : > { %v2356_v31 = vmul.f32 1.442695, %v2353_v30 }
 0xa30   : > { %4450 = vpow2.f32 %v2354_v19 }
 0xa31   : > { %4452 = vpow2.f32 %v2356_v31 }
 0xa3a   : > { %v4451_v33 = vpop.eup %4450 }
 0xa3b   : > { %v4453_v25 = vpop.eup %4452  ;;  %v2358_v34 = vsel %vm1213_vm5, %v4451_v33, 0.0 }
 0xa3c   : > { %v2361_v37 = vsel %vm1213_vm5, %v4453_v25, 0.0  ;;  %2359 = vadd.xlane.f32.xlu0 %v2358_v34 }
 0xa3d   : > { %2362 = vadd.xlane.f32.xlu1 %v2361_v37 }
 0xac9   : > { %v2360_v38 = vpop.xlane.xlu0 %2359 }
 0xaca   : > { %4454 = vrcp.f32 %v2360_v38  ;;  %v2363_v39 = vpop.xlane.xlu1 %2362 }
 0xacb   : > { %4456 = vrcp.f32 %v2363_v39 }
 0xad4   : > { %v4455_v54 = vpop.eup %4454 }
 0xad5   : > { %v4457_v35 = vpop.eup %4456  ;;  %v2366_v4 = vmul.f32 %v4455_v54, %v4451_v33 }
 0xad6   : > { %v2367_v41 = vmul.f32 %v4457_v35, %v4453_v25 }
 0xad7   : > { %v2368_v43 = vsel %vm1213_vm5, %v2366_v4, 0.0  ;;  %2487 = vst.msk [vmem:[%s5653_s12] sm:$0xff] %vm1213_vm5, %v2366_v4 }
 0xad8   : > { %2488 = vst.msk [vmem:[%s5653_s12 + $0x8] sm:$0xff] %vm1213_vm5, %v2367_v41  ;;  %v2369_v45 = vsel %vm1213_vm5, %v2367_v41, 0.0 }
 0xad9   : > { %v2370_v46 = vadd.f32 %v2369_v45, %v2368_v43 }
 0xadb   : > { %v2371_v47 = vrot.slane %v2370_v46, 4 }
 0xadd   : > { %v2372_v49 = vadd.f32 %v2371_v47, %v2370_v46 }
 0xadf   : > { %v2373_v50 = vrot.slane %v2372_v49, 2 }
 0xae1   : > { %v2374_v51 = vadd.f32 %v2373_v50, %v2372_v49 }
 0xae3   : > { %v2375_v12 = vrot.slane %v2374_v51, 1 }
 0xae5   : > { %v2376_v53 = vadd.f32 %v2375_v12, %v2374_v51 }
 0xae7   : > { %v2377_v55 = vadd.f32 1e-06, %v2376_v53 }
 0xae9   : > { %4458 = vrcp.f32 %v2377_v55 }
 0xaf3   : > { %v4459_v40 = vpop.eup %4458 }
 0xaf4   : > { %v2379_v48 = vmul.f32 %v4459_v40, %v2366_v4  ;;  %v2380_v32 = vmul.f32 %v4459_v40, %v2367_v41 }
 0xaf6   : > { %2381 = vxpose.xlu0.b32.start [1/2] (short) (narrow) %v2379_v48, 8 }
 0xafa   : > { %2382 = vxpose.xlu0.b32.end [2/2] (short) (narrow) %v2380_v32, 8 }
 0xb76   : > { %v2397_v59 = vpop.trf.xlu0 }
 0xb77   : > { %3717 = vmatmul.mubr.msk.f32.vlgmr.msra.gmra.mrb[10].mxu0 %vm1281_vm6, %v2397_v59 }
 0xc4a   : > { %v2482_v57 = vpop.f32.mrb[10].mxu0 }
 0xc4b   : > { %2489 = vst [vmem:[#allocation2] sm:$0xf] %v2482_v57  ;;  %v3718_v60 = vpop.f32.mrb[11].mxu0  ;;  %v2490_v62 = vsub.f32 %v2482_v57, %v5236_v21 }
 0xc4d   : > { %v2491_v0 = vand.u32 2147483647, %v2490_v62 }
 0xc4f   : > { %v2492_v1 = vsel %vm1361_vm7, %v2491_v0, 0.0 }
 0xc50   : > { %2493 = vadd.xlane.f32.xlu1 %v2492_v1 }
 0xcdd   : > { %v2494_v6 = vpop.xlane.xlu1 %2493 }
 0xcde   : > { %v2495_v2 = vrot.slane %v2494_v6, 4 }
 0xce0   : > { %v2496_v58 = vadd.f32 %v2495_v2, %v2494_v6 }
 0xce2   : > { %v2497_v13 = vrot.slane %v2496_v58, 2 }
 0xce4   : > { %v2498_v44 = vadd.f32 %v2497_v13, %v2496_v58 }
 0xce6   : > { %v2499_v56 = vrot.slane %v2498_v44, 1 }
 0xce8   : > { %v2500_v61 = vadd.f32 %v2499_v56, %v2498_v44 }
 0xcea   : > { %4401 = vpush %v2500_v61 }
 0xd1b   : > { %s4402_s27 = spop %4401 }
 0xd1c   : > { %2502 = sst [smem:[#allocation3]] %s4402_s27 }
 0xd1d PF: > { %s1379_s29 = sadd.s32 1, %s4490_s29  }
 0xd1e   : > { %p1376_p1 = scmp.ge.s32.totalorder %s1379_s29, 100  }
 0xd1f   :  { %s4500_s28 = smov (%p1376_p1), [#allocation5]  }
 0xd20   :  { %1378 = sbr.rel (!%p1376_p1) target bundleno = 1693 (0x69d), region = 84  ;;  %s2509_s0 = sshll.u32 (%p1376_p1), %s4500_s28, 4  ;;  %s2510_s0 = int_to_ptr.vmem [resolvable:$true] %s2509_s0 }
 0xd21   :  { %s4460_s10 = scalar_lea.vmem (%p1376_p1), %s2510_s0, 64  ;;  %p4465_p3 = scmp.lt.s32.totalorder (%p1376_p1), %s2510_s0, %s2510_s0 }
 0xd22   :  { %p4461_p2 = scmp.ne.s32.totalorder (%p1376_p1), %s2510_s0, %s4460_s10  ;;  %p4466_p4 = scmp.lt.s32.totalorder (%p1376_p1), %s4460_s10, %s4460_s10 }
 0xd24   :  { %p4467_p5 = por (%p1376_p1), %p4466_p4, %p4465_p3 }
 0xd26   :  { %p4468_p6 = pnand (%p1376_p1), %p4467_p5, %p4461_p2 }
 0xd28   :  { %4471 = shalt.err (!%p4468_p6)
}
 0xd29   :  { %s4472_s2 = scalar_lea.hbm %s5652_s11, 64 }
 0xd2a   :  { %p4473_p7 = scmp.ne.s32.totalorder %s5652_s11, %s4472_s2  ;;  %p4476_p8 = scmp.lt.u32.totalorder %s4472_s2, %s5652_s11 }
 0xd2c   :  { %p4478_p9 = pnand %p4476_p8, %p4473_p7 }
 0xd2e   :  { %4481 = shalt.err (!%p4478_p9)
}
 0xd2f   :  { %2512 = dma.vmem_to_hbm [thread:$0]  %s2510_s0, 64, %s5652_s11, [#allocation6]  }
 0xd30   :  { %4486 = dma.done.wait [#allocation6], 64  }
 0xd31   :  { %4487 = vsyncadd [#allocation6], 4294967232 }
 0xd32   :  { %2520 = vsyncpa [#allocation6], 1 }

</bundles_post_ra>
